<compile_context>
chip_gen: v7x
topology: tpu7x:2x2x1
jax: 0.10.0
libtpu: 0.0.40
codegen_flags: <defaults>
</compile_context>

<pallas_src>
import numpy as np
import jax
import jax.numpy as jnp
from jax.experimental import pallas as pl
from jax.experimental.pallas import tpu as pltpu


# --------------------------------- kernel -----------------------------------

def _quantum_kernel(x_ref, coef_ref, out_ref):
    TB, n = out_ref.shape
    D = 2 ** n
    L = 2 * D                     # combined [Re | Im] lane width (128 for n=6)
    nlayers = coef_ref.shape[0] // (4 * n)

    lane = jax.lax.broadcasted_iota(jnp.int32, (1, L), 1)
    # -1 on the Re half, +1 on the Im half (sign of the i-mixing in RX encoding)
    sgn_im = jnp.where(lane >= D, 1.0, -1.0).astype(jnp.float32)

    # bit[q]: qubit-q bit of the amplitude index is set (same pattern in both halves)
    bit = []
    for qb in range(n):
        m = 1 << (n - 1 - qb)
        bit.append((lane & m) != 0)

    def flip(S, qb):
        """S[..., l] -> S[..., l ^ m] (bit-flip of qubit qb, Re and Im at once)."""
        m = 1 << (n - 1 - qb)
        up = pltpu.roll(S, m, axis=1)          # up[l]   = S[l - m]
        down = pltpu.roll(S, L - m, axis=1)    # down[l] = S[l + m]
        return jnp.where(bit[qb], up, down)

    def swap_halves(S):
        """[re | im] -> [im | re]."""
        return pltpu.roll(S, D, axis=1)

    # initial state |0...0>: Re amplitude 1 at index 0
    col = jax.lax.broadcasted_iota(jnp.int32, (TB, L), 1)
    S = jnp.where(col == 0, 1.0, 0.0).astype(jnp.float32)

    # ---- data-encoding layer: RX(x[b, i]) on qubit i (per-batch angles) ----
    for i in range(n):
        half = 0.5 * x_ref[:, i:i + 1]                 # (TB, 1) static column slice
        c = jnp.cos(half)                              # EUP (otherwise idle)
        s = jnp.sin(half)
        Sf_sw = swap_halves(flip(S, i))                # [im_f | re_f]
        # re' = c*re + s*im_f ; im' = c*im - s*re_f
        S = c * S - sgn_im * (s * Sf_sw)

    # ---------------------------- entangling layers --------------------------
    for j in range(nlayers):
        # CNOT chain: CNOT(ctrl, ctrl+1) as conditional bit-flips (exact, no MXU)
        for ctrl in range(n - 1):
            S = jnp.where(bit[ctrl], flip(S, ctrl + 1), S)
        # fused RX(w[2j, i]) -> RY(w[2j+1, i]): precomputed lane coefficients
        for i in range(n):
            base = 4 * (j * n + i)
            cf = coef_ref[base:base + 4, :]            # (4, L) VMEM load
            A = cf[0:1, :]                             # u
            Bc = cf[1:2, :]                            # sgn0 * p
            Cc = cf[2:3, :]                            # sgn_im * sgn0 * v
            Ec = cf[3:4, :]                            # sgn_im * q
            Sf = flip(S, i)                            # [re_f | im_f]
            S_sw = swap_halves(S)                      # [im   | re  ]
            Sf_sw = swap_halves(Sf)                    # [im_f | re_f]
            S = A * S + Bc * Sf + Cc * S_sw + Ec * Sf_sw

    # ---- ypred[b, i] = Re(<psi| X_i |psi>) = sum_l S[l] * S[l ^ m_i] --------
    es = [jnp.sum(S * flip(S, i), axis=1, keepdims=True) for i in range(n)]
    out_ref[...] = jnp.concatenate(es, axis=1)         # single dense (TB, n) store


# -------------------------------- wrapper -----------------------------------

def _gate_coefficients(weights, n, nlayers):
    """Per-gate lane coefficient table (4*nlayers*n, 2*2**n) for the fused RX·RY gate."""
    D = 2 ** n
    L = 2 * D
    lane = np.arange(L)
    sgn_im = np.where(lane >= D, 1.0, -1.0).astype(np.float32)            # (L,)
    sgn0 = np.stack(
        [np.where((lane & (1 << (n - 1 - i))) != 0, -1.0, 1.0) for i in range(n)]
    ).astype(np.float32)                                                  # (n, L)

    # fused RX(a)·RY(b):  G = RY(b) @ RX(a) = [[u+iv, p+iq], [-p+iq, u-iv]]
    wa = weights[0::2]                          # (nlayers, n) RX angles
    wb = weights[1::2]                          # (nlayers, n) RY angles
    ca, sa = jnp.cos(wa * 0.5), jnp.sin(wa * 0.5)
    cb, sb = jnp.cos(wb * 0.5), jnp.sin(wb * 0.5)
    u = cb * ca
    v = sb * sa
    p = -sb * ca
    q = -cb * sa

    sgn_im_j = jnp.asarray(sgn_im)              # (L,)
    sgn0_j = jnp.asarray(sgn0)                  # (n, L)
    A = u[..., None] * jnp.ones((L,), jnp.float32)                  # (nlayers, n, L)
    B = p[..., None] * sgn0_j[None]                                 # g * p
    C = v[..., None] * (sgn_im_j[None, None] * sgn0_j[None])        # sgn_im * g * v
    E = q[..., None] * sgn_im_j[None, None]                         # sgn_im * q
    coef = jnp.stack([A, B, C, E], axis=2)                          # (nlayers, n, 4, L)
    return coef.reshape(nlayers * n * 4, L).astype(jnp.float32)


def quantum_net_forward(x, weights, *, n, nlayers):
    """Equivalent of QuantumNet.forward: circuit f vmapped over batch (dim 0 of x)."""
    B = x.shape[0]
    x = x.astype(jnp.float32)
    weights = weights.astype(jnp.float32)
    D = 2 ** n
    L = 2 * D   # layout targets L <= 128 (one vreg lane width); correct (slower) beyond.

    coef = _gate_coefficients(weights, n, nlayers)      # (4*nlayers*n, L) ~ 24 KiB

    # Batch tiling: TB rows per grid step (multiple of 8 sublanes, capped at 256),
    # grid over batch tiles marked "parallel" (v7x dual-core sharding).
    TB = 256 if B >= 256 else max(8, ((B + 7) // 8) * 8)
    B_pad = ((B + TB - 1) // TB) * TB
    x_pad = jnp.zeros((B_pad, n), jnp.float32).at[:B].set(x)

    G4 = coef.shape[0]
    vmem = pltpu.MemorySpace.VMEM

    # TODO(synk): torch autograd / dlpack interface glue of QuantumNet is host-side
    # framework plumbing with no Pallas equivalent; only the forward math is kerneled.
    out = pl.pallas_call(
        _quantum_kernel,
        out_shape=jax.ShapeDtypeStruct((B_pad, n), jnp.float32),
        grid=(B_pad // TB,),
        in_specs=[
            pl.BlockSpec((TB, n), lambda b: (b, 0), memory_space=vmem),   # x tile
            pl.BlockSpec((G4, L), lambda b: (0, 0), memory_space=vmem),   # gate coeffs
        ],
        out_specs=pl.BlockSpec((TB, n), lambda b: (b, 0), memory_space=vmem),
        compiler_params=pltpu.CompilerParams(dimension_semantics=("parallel",)),
    )(x_pad, coef)
    return out[:B]


# ---------------------- independent numpy reference -------------------------

def _reference_numpy(x, w, n, nlayers):
    B = x.shape[0]
    D = 2 ** n
    out = np.zeros((B, n), dtype=np.float32)
    X = np.array([[0, 1], [1, 0]], dtype=np.complex64)

    def apply_1q(psi, G, q):
        t = psi.reshape((2,) * n)
        t = np.tensordot(G, t, axes=([1], [q]))
        t = np.moveaxis(t, 0, q)
        return t.reshape(D)

    def rx(t):
        c, s = np.cos(t / 2), np.sin(t / 2)
        return np.array([[c, -1j * s], [-1j * s, c]], dtype=np.complex64)

    def ry(t):
        c, s = np.cos(t / 2), np.sin(t / 2)
        return np.array([[c, -s], [s, c]], dtype=np.complex64)

    def cnot(psi, ctrl, tgt):
        t = psi.reshape((2,) * n).copy()
        idx = [slice(None)] * n
        idx[ctrl] = 1
        sub = t[tuple(idx)]
        t[tuple(idx)] = np.flip(sub, axis=tgt - 1)   # tgt = ctrl + 1 here
        return t.reshape(D)

    for b in range(B):
        psi = np.zeros(D, dtype=np.complex64)
        psi[0] = 1.0
        for i in range(n):
            psi = apply_1q(psi, rx(x[b, i]), i)
        for j in range(nlayers):
            for i in range(n - 1):
                psi = cnot(psi, i, i + 1)
            for i in range(n):
                psi = apply_1q(psi, rx(w[2 * j, i]), i)
                psi = apply_1q(psi, ry(w[2 * j + 1, i]), i)
        for i in range(n):
            out[b, i] = np.real(np.vdot(psi, apply_1q(psi, X, i)))
    return out


# ---------------------------------- main -------------------------------------

if __name__ == "__main__":
    n, nlayers, batch = 6, 2, 2

    key = jax.random.PRNGKey(0)
    k1, k2 = jax.random.split(key)
    # module input (torch.ones([batch, n]) style call, here deterministic random)
    x = jax.random.normal(k1, (batch, n), dtype=jnp.float32)
    # q_weights parameter, shape [2*nlayers, n], torch.randn-style init
    weights = jax.random.normal(k2, (2 * nlayers, n), dtype=jnp.float32)

    y = quantum_net_forward(x, weights, n=n, nlayers=nlayers)
    y = jax.block_until_ready(y)

    ref = _reference_numpy(np.asarray(x), np.asarray(weights), n, nlayers)
    assert y.shape == (batch, n)
    assert np.allclose(np.asarray(y), ref, atol=1e-3, rtol=1e-3), (np.asarray(y), ref)

    print("KERNEL_OK")
</pallas_src>

<mosaic_0001>
module attributes {stable_mosaic.version = 11 : i64} {
  func.func @_quantum_kernel(%arg0: i32, %arg1: memref<8x6xf32, #tpu.memory_space<vmem>>, %arg2: memref<48x128xf32, #tpu.memory_space<vmem>>, %arg3: memref<8x6xf32, #tpu.memory_space<vmem>>) attributes {dimension_semantics = [#tpu.dimension_semantics<parallel>], iteration_bounds = array<i64: 1>, scalar_prefetch = 0 : i64, scratch_operands = 0 : i64, tpu.core_type = #tpu.core_type<tc>, window_params = [{transform_indices = @transform_0, window_bounds = array<i64: 8, 6>}, {pipeline_mode = #tpu.pipeline_mode<synchronous>, transform_indices = @transform_1, window_bounds = array<i64: 48, 128>}, {transform_indices = @transform_2, window_bounds = array<i64: 8, 6>}]} {
    %0 = tpu.iota {dimensions = array<i32: 1>} : vector<1x128xi32>
    %c64_i32 = arith.constant 64 : i32
    %1 = vector.broadcast %c64_i32 : i32 to vector<1x128xi32>
    %2 = arith.cmpi sge, %0, %1 : vector<1x128xi32>
    %cst = arith.constant 1.000000e+00 : f32
    %cst_0 = arith.constant -1.000000e+00 : f32
    %3 = vector.broadcast %cst : f32 to vector<1x128xf32>
    %4 = vector.broadcast %cst_0 : f32 to vector<1x128xf32>
    %5 = arith.select %2, %3, %4 : vector<1x128xi1>, vector<1x128xf32>
    %c32_i32 = arith.constant 32 : i32
    %6 = vector.broadcast %c32_i32 : i32 to vector<1x128xi32>
    %7 = arith.andi %0, %6 : vector<1x128xi32>
    %c0_i32 = arith.constant 0 : i32
    %8 = vector.broadcast %c0_i32 : i32 to vector<1x128xi32>
    %9 = arith.cmpi ne, %7, %8 : vector<1x128xi32>
    %c16_i32 = arith.constant 16 : i32
    %10 = vector.broadcast %c16_i32 : i32 to vector<1x128xi32>
    %11 = arith.andi %0, %10 : vector<1x128xi32>
    %c0_i32_1 = arith.constant 0 : i32
    %12 = vector.broadcast %c0_i32_1 : i32 to vector<1x128xi32>
    %13 = arith.cmpi ne, %11, %12 : vector<1x128xi32>
    %c8_i32 = arith.constant 8 : i32
    %14 = vector.broadcast %c8_i32 : i32 to vector<1x128xi32>
    %15 = arith.andi %0, %14 : vector<1x128xi32>
    %c0_i32_2 = arith.constant 0 : i32
    %16 = vector.broadcast %c0_i32_2 : i32 to vector<1x128xi32>
    %17 = arith.cmpi ne, %15, %16 : vector<1x128xi32>
    %c4_i32 = arith.constant 4 : i32
    %18 = vector.broadcast %c4_i32 : i32 to vector<1x128xi32>
    %19 = arith.andi %0, %18 : vector<1x128xi32>
    %c0_i32_3 = arith.constant 0 : i32
    %20 = vector.broadcast %c0_i32_3 : i32 to vector<1x128xi32>
    %21 = arith.cmpi ne, %19, %20 : vector<1x128xi32>
    %c2_i32 = arith.constant 2 : i32
    %22 = vector.broadcast %c2_i32 : i32 to vector<1x128xi32>
    %23 = arith.andi %0, %22 : vector<1x128xi32>
    %c0_i32_4 = arith.constant 0 : i32
    %24 = vector.broadcast %c0_i32_4 : i32 to vector<1x128xi32>
    %25 = arith.cmpi ne, %23, %24 : vector<1x128xi32>
    %c1_i32 = arith.constant 1 : i32
    %26 = vector.broadcast %c1_i32 : i32 to vector<1x128xi32>
    %27 = arith.andi %0, %26 : vector<1x128xi32>
    %c0_i32_5 = arith.constant 0 : i32
    %28 = vector.broadcast %c0_i32_5 : i32 to vector<1x128xi32>
    %29 = arith.cmpi ne, %27, %28 : vector<1x128xi32>
    %30 = tpu.iota {dimensions = array<i32: 1>} : vector<8x128xi32>
    %c0_i32_6 = arith.constant 0 : i32
    %31 = vector.broadcast %c0_i32_6 : i32 to vector<8x128xi32>
    %32 = arith.cmpi eq, %30, %31 : vector<8x128xi32>
    %cst_7 = arith.constant 1.000000e+00 : f32
    %cst_8 = arith.constant 0.000000e+00 : f32
    %33 = vector.broadcast %cst_7 : f32 to vector<8x128xf32>
    %34 = vector.broadcast %cst_8 : f32 to vector<8x128xf32>
    %35 = arith.select %32, %33, %34 : vector<8x128xi1>, vector<8x128xf32>
    %c0 = arith.constant 0 : index
    %c0_9 = arith.constant 0 : index
    %36 = vector.load %arg1[%c0, %c0_9] : memref<8x6xf32, #tpu.memory_space<vmem>>, vector<8x1xf32>
    %cst_10 = arith.constant 5.000000e-01 : f32
    %37 = vector.broadcast %cst_10 : f32 to vector<8x1xf32>
    %38 = arith.mulf %37, %36 : vector<8x1xf32>
    %39 = math.cos %38 : vector<8x1xf32>
    %40 = math.sin %38 : vector<8x1xf32>
    %c32_i32_11 = arith.constant 32 : i32
    %41 = tpu.dynamic_rotate %35 by %c32_i32_11 dim 1 : vector<8x128xf32>, i32 -> vector<8x128xf32>
    %c96_i32 = arith.constant 96 : i32
    %42 = tpu.dynamic_rotate %35 by %c96_i32 dim 1 : vector<8x128xf32>, i32 -> vector<8x128xf32>
    %43 = vector.shape_cast %9 : vector<1x128xi1> to vector<1x128xi1>
    %44 = vector.broadcast %43 : vector<1x128xi1> to vector<8x128xi1>
    %45 = arith.select %44, %41, %42 : vector<8x128xi1>, vector<8x128xf32>
    %c64_i32_12 = arith.constant 64 : i32
    %46 = tpu.dynamic_rotate %45 by %c64_i32_12 dim 1 : vector<8x128xf32>, i32 -> vector<8x128xf32>
    %47 = vector.broadcast %39 : vector<8x1xf32> to vector<8x128xf32>
    %48 = arith.mulf %47, %35 : vector<8x128xf32>
    %49 = vector.broadcast %40 : vector<8x1xf32> to vector<8x128xf32>
    %50 = arith.mulf %49, %46 : vector<8x128xf32>
    %51 = vector.broadcast %5 : vector<1x128xf32> to vector<8x128xf32>
    %52 = arith.mulf %51, %50 : vector<8x128xf32>
    %53 = arith.subf %48, %52 : vector<8x128xf32>
    %c0_13 = arith.constant 0 : index
    %c1 = arith.constant 1 : index
    %54 = vector.load %arg1[%c0_13, %c1] : memref<8x6xf32, #tpu.memory_space<vmem>>, vector<8x1xf32>
    %cst_14 = arith.constant 5.000000e-01 : f32
    %55 = vector.broadcast %cst_14 : f32 to vector<8x1xf32>
    %56 = arith.mulf %55, %54 : vector<8x1xf32>
    %57 = math.cos %56 : vector<8x1xf32>
    %58 = math.sin %56 : vector<8x1xf32>
    %c16_i32_15 = arith.constant 16 : i32
    %59 = tpu.dynamic_rotate %53 by %c16_i32_15 dim 1 : vector<8x128xf32>, i32 -> vector<8x128xf32>
    %c112_i32 = arith.constant 112 : i32
    %60 = tpu.dynamic_rotate %53 by %c112_i32 dim 1 : vector<8x128xf32>, i32 -> vector<8x128xf32>
    %61 = vector.shape_cast %13 : vector<1x128xi1> to vector<1x128xi1>
    %62 = vector.broadcast %61 : vector<1x128xi1> to vector<8x128xi1>
    %63 = arith.select %62, %59, %60 : vector<8x128xi1>, vector<8x128xf32>
    %c64_i32_16 = arith.constant 64 : i32
    %64 = tpu.dynamic_rotate %63 by %c64_i32_16 dim 1 : vector<8x128xf32>, i32 -> vector<8x128xf32>
    %65 = vector.broadcast %57 : vector<8x1xf32> to vector<8x128xf32>
    %66 = arith.mulf %65, %53 : vector<8x128xf32>
    %67 = vector.broadcast %58 : vector<8x1xf32> to vector<8x128xf32>
    %68 = arith.mulf %67, %64 : vector<8x128xf32>
    %69 = vector.broadcast %5 : vector<1x128xf32> to vector<8x128xf32>
    %70 = arith.mulf %69, %68 : vector<8x128xf32>
    %71 = arith.subf %66, %70 : vector<8x128xf32>
    %c0_17 = arith.constant 0 : index
    %c2 = arith.constant 2 : index
    %72 = vector.load %arg1[%c0_17, %c2] : memref<8x6xf32, #tpu.memory_space<vmem>>, vector<8x1xf32>
    %cst_18 = arith.constant 5.000000e-01 : f32
    %73 = vector.broadcast %cst_18 : f32 to vector<8x1xf32>
    %74 = arith.mulf %73, %72 : vector<8x1xf32>
    %75 = math.cos %74 : vector<8x1xf32>
    %76 = math.sin %74 : vector<8x1xf32>
    %c8_i32_19 = arith.constant 8 : i32
    %77 = tpu.dynamic_rotate %71 by %c8_i32_19 dim 1 : vector<8x128xf32>, i32 -> vector<8x128xf32>
    %c120_i32 = arith.constant 120 : i32
    %78 = tpu.dynamic_rotate %71 by %c120_i32 dim 1 : vector<8x128xf32>, i32 -> vector<8x128xf32>
    %79 = vector.shape_cast %17 : vector<1x128xi1> to vector<1x128xi1>
    %80 = vector.broadcast %79 : vector<1x128xi1> to vector<8x128xi1>
    %81 = arith.select %80, %77, %78 : vector<8x128xi1>, vector<8x128xf32>
    %c64_i32_20 = arith.constant 64 : i32
    %82 = tpu.dynamic_rotate %81 by %c64_i32_20 dim 1 : vector<8x128xf32>, i32 -> vector<8x128xf32>
    %83 = vector.broadcast %75 : vector<8x1xf32> to vector<8x128xf32>
    %84 = arith.mulf %83, %71 : vector<8x128xf32>
    %85 = vector.broadcast %76 : vector<8x1xf32> to vector<8x128xf32>
    %86 = arith.mulf %85, %82 : vector<8x128xf32>
    %87 = vector.broadcast %5 : vector<1x128xf32> to vector<8x128xf32>
    %88 = arith.mulf %87, %86 : vector<8x128xf32>
    %89 = arith.subf %84, %88 : vector<8x128xf32>
    %c0_21 = arith.constant 0 : index
    %c3 = arith.constant 3 : index
    %90 = vector.load %arg1[%c0_21, %c3] : memref<8x6xf32, #tpu.memory_space<vmem>>, vector<8x1xf32>
    %cst_22 = arith.constant 5.000000e-01 : f32
    %91 = vector.broadcast %cst_22 : f32 to vector<8x1xf32>
    %92 = arith.mulf %91, %90 : vector<8x1xf32>
    %93 = math.cos %92 : vector<8x1xf32>
    %94 = math.sin %92 : vector<8x1xf32>
    %c4_i32_23 = arith.constant 4 : i32
    %95 = tpu.dynamic_rotate %89 by %c4_i32_23 dim 1 : vector<8x128xf32>, i32 -> vector<8x128xf32>
    %c124_i32 = arith.constant 124 : i32
    %96 = tpu.dynamic_rotate %89 by %c124_i32 dim 1 : vector<8x128xf32>, i32 -> vector<8x128xf32>
    %97 = vector.shape_cast %21 : vector<1x128xi1> to vector<1x128xi1>
    %98 = vector.broadcast %97 : vector<1x128xi1> to vector<8x128xi1>
    %99 = arith.select %98, %95, %96 : vector<8x128xi1>, vector<8x128xf32>
    %c64_i32_24 = arith.constant 64 : i32
    %100 = tpu.dynamic_rotate %99 by %c64_i32_24 dim 1 : vector<8x128xf32>, i32 -> vector<8x128xf32>
    %101 = vector.broadcast %93 : vector<8x1xf32> to vector<8x128xf32>
    %102 = arith.mulf %101, %89 : vector<8x128xf32>
    %103 = vector.broadcast %94 : vector<8x1xf32> to vector<8x128xf32>
    %104 = arith.mulf %103, %100 : vector<8x128xf32>
    %105 = vector.broadcast %5 : vector<1x128xf32> to vector<8x128xf32>
    %106 = arith.mulf %105, %104 : vector<8x128xf32>
    %107 = arith.subf %102, %106 : vector<8x128xf32>
    %c0_25 = arith.constant 0 : index
    %c4 = arith.constant 4 : index
    %108 = vector.load %arg1[%c0_25, %c4] : memref<8x6xf32, #tpu.memory_space<vmem>>, vector<8x1xf32>
    %cst_26 = arith.constant 5.000000e-01 : f32
    %109 = vector.broadcast %cst_26 : f32 to vector<8x1xf32>
    %110 = arith.mulf %109, %108 : vector<8x1xf32>
    %111 = math.cos %110 : vector<8x1xf32>
    %112 = math.sin %110 : vector<8x1xf32>
    %c2_i32_27 = arith.constant 2 : i32
    %113 = tpu.dynamic_rotate %107 by %c2_i32_27 dim 1 : vector<8x128xf32>, i32 -> vector<8x128xf32>
    %c126_i32 = arith.constant 126 : i32
    %114 = tpu.dynamic_rotate %107 by %c126_i32 dim 1 : vector<8x128xf32>, i32 -> vector<8x128xf32>
    %115 = vector.shape_cast %25 : vector<1x128xi1> to vector<1x128xi1>
    %116 = vector.broadcast %115 : vector<1x128xi1> to vector<8x128xi1>
    %117 = arith.select %116, %113, %114 : vector<8x128xi1>, vector<8x128xf32>
    %c64_i32_28 = arith.constant 64 : i32
    %118 = tpu.dynamic_rotate %117 by %c64_i32_28 dim 1 : vector<8x128xf32>, i32 -> vector<8x128xf32>
    %119 = vector.broadcast %111 : vector<8x1xf32> to vector<8x128xf32>
    %120 = arith.mulf %119, %107 : vector<8x128xf32>
    %121 = vector.broadcast %112 : vector<8x1xf32> to vector<8x128xf32>
    %122 = arith.mulf %121, %118 : vector<8x128xf32>
    %123 = vector.broadcast %5 : vector<1x128xf32> to vector<8x128xf32>
    %124 = arith.mulf %123, %122 : vector<8x128xf32>
    %125 = arith.subf %120, %124 : vector<8x128xf32>
    %c0_29 = arith.constant 0 : index
    %c5 = arith.constant 5 : index
    %126 = vector.load %arg1[%c0_29, %c5] : memref<8x6xf32, #tpu.memory_space<vmem>>, vector<8x1xf32>
    %cst_30 = arith.constant 5.000000e-01 : f32
    %127 = vector.broadcast %cst_30 : f32 to vector<8x1xf32>
    %128 = arith.mulf %127, %126 : vector<8x1xf32>
    %129 = math.cos %128 : vector<8x1xf32>
    %130 = math.sin %128 : vector<8x1xf32>
    %c1_i32_31 = arith.constant 1 : i32
    %131 = tpu.dynamic_rotate %125 by %c1_i32_31 dim 1 : vector<8x128xf32>, i32 -> vector<8x128xf32>
    %c127_i32 = arith.constant 127 : i32
    %132 = tpu.dynamic_rotate %125 by %c127_i32 dim 1 : vector<8x128xf32>, i32 -> vector<8x128xf32>
    %133 = vector.shape_cast %29 : vector<1x128xi1> to vector<1x128xi1>
    %134 = vector.broadcast %133 : vector<1x128xi1> to vector<8x128xi1>
    %135 = arith.select %134, %131, %132 : vector<8x128xi1>, vector<8x128xf32>
    %c64_i32_32 = arith.constant 64 : i32
    %136 = tpu.dynamic_rotate %135 by %c64_i32_32 dim 1 : vector<8x128xf32>, i32 -> vector<8x128xf32>
    %137 = vector.broadcast %129 : vector<8x1xf32> to vector<8x128xf32>
    %138 = arith.mulf %137, %125 : vector<8x128xf32>
    %139 = vector.broadcast %130 : vector<8x1xf32> to vector<8x128xf32>
    %140 = arith.mulf %139, %136 : vector<8x128xf32>
    %141 = vector.broadcast %5 : vector<1x128xf32> to vector<8x128xf32>
    %142 = arith.mulf %141, %140 : vector<8x128xf32>
    %143 = arith.subf %138, %142 : vector<8x128xf32>
    %c16_i32_33 = arith.constant 16 : i32
    %144 = tpu.dynamic_rotate %143 by %c16_i32_33 dim 1 : vector<8x128xf32>, i32 -> vector<8x128xf32>
    %c112_i32_34 = arith.constant 112 : i32
    %145 = tpu.dynamic_rotate %143 by %c112_i32_34 dim 1 : vector<8x128xf32>, i32 -> vector<8x128xf32>
    %146 = vector.shape_cast %13 : vector<1x128xi1> to vector<1x128xi1>
    %147 = vector.broadcast %146 : vector<1x128xi1> to vector<8x128xi1>
    %148 = arith.select %147, %144, %145 : vector<8x128xi1>, vector<8x128xf32>
    %149 = vector.shape_cast %9 : vector<1x128xi1> to vector<1x128xi1>
    %150 = vector.broadcast %149 : vector<1x128xi1> to vector<8x128xi1>
    %151 = arith.select %150, %148, %143 : vector<8x128xi1>, vector<8x128xf32>
    %c8_i32_35 = arith.constant 8 : i32
    %152 = tpu.dynamic_rotate %151 by %c8_i32_35 dim 1 : vector<8x128xf32>, i32 -> vector<8x128xf32>
    %c120_i32_36 = arith.constant 120 : i32
    %153 = tpu.dynamic_rotate %151 by %c120_i32_36 dim 1 : vector<8x128xf32>, i32 -> vector<8x128xf32>
    %154 = vector.shape_cast %17 : vector<1x128xi1> to vector<1x128xi1>
    %155 = vector.broadcast %154 : vector<1x128xi1> to vector<8x128xi1>
    %156 = arith.select %155, %152, %153 : vector<8x128xi1>, vector<8x128xf32>
    %157 = vector.shape_cast %13 : vector<1x128xi1> to vector<1x128xi1>
    %158 = vector.broadcast %157 : vector<1x128xi1> to vector<8x128xi1>
    %159 = arith.select %158, %156, %151 : vector<8x128xi1>, vector<8x128xf32>
    %c4_i32_37 = arith.constant 4 : i32
    %160 = tpu.dynamic_rotate %159 by %c4_i32_37 dim 1 : vector<8x128xf32>, i32 -> vector<8x128xf32>
    %c124_i32_38 = arith.constant 124 : i32
    %161 = tpu.dynamic_rotate %159 by %c124_i32_38 dim 1 : vector<8x128xf32>, i32 -> vector<8x128xf32>
    %162 = vector.shape_cast %21 : vector<1x128xi1> to vector<1x128xi1>
    %163 = vector.broadcast %162 : vector<1x128xi1> to vector<8x128xi1>
    %164 = arith.select %163, %160, %161 : vector<8x128xi1>, vector<8x128xf32>
    %165 = vector.shape_cast %17 : vector<1x128xi1> to vector<1x128xi1>
    %166 = vector.broadcast %165 : vector<1x128xi1> to vector<8x128xi1>
    %167 = arith.select %166, %164, %159 : vector<8x128xi1>, vector<8x128xf32>
    %c2_i32_39 = arith.constant 2 : i32
    %168 = tpu.dynamic_rotate %167 by %c2_i32_39 dim 1 : vector<8x128xf32>, i32 -> vector<8x128xf32>
    %c126_i32_40 = arith.constant 126 : i32
    %169 = tpu.dynamic_rotate %167 by %c126_i32_40 dim 1 : vector<8x128xf32>, i32 -> vector<8x128xf32>
    %170 = vector.shape_cast %25 : vector<1x128xi1> to vector<1x128xi1>
    %171 = vector.broadcast %170 : vector<1x128xi1> to vector<8x128xi1>
    %172 = arith.select %171, %168, %169 : vector<8x128xi1>, vector<8x128xf32>
    %173 = vector.shape_cast %21 : vector<1x128xi1> to vector<1x128xi1>
    %174 = vector.broadcast %173 : vector<1x128xi1> to vector<8x128xi1>
    %175 = arith.select %174, %172, %167 : vector<8x128xi1>, vector<8x128xf32>
    %c1_i32_41 = arith.constant 1 : i32
    %176 = tpu.dynamic_rotate %175 by %c1_i32_41 dim 1 : vector<8x128xf32>, i32 -> vector<8x128xf32>
    %c127_i32_42 = arith.constant 127 : i32
    %177 = tpu.dynamic_rotate %175 by %c127_i32_42 dim 1 : vector<8x128xf32>, i32 -> vector<8x128xf32>
    %178 = vector.shape_cast %29 : vector<1x128xi1> to vector<1x128xi1>
    %179 = vector.broadcast %178 : vector<1x128xi1> to vector<8x128xi1>
    %180 = arith.select %179, %176, %177 : vector<8x128xi1>, vector<8x128xf32>
    %181 = vector.shape_cast %25 : vector<1x128xi1> to vector<1x128xi1>
    %182 = vector.broadcast %181 : vector<1x128xi1> to vector<8x128xi1>
    %183 = arith.select %182, %180, %175 : vector<8x128xi1>, vector<8x128xf32>
    %c0_43 = arith.constant 0 : index
    %c0_44 = arith.constant 0 : index
    %184 = vector.load %arg2[%c0_43, %c0_44] : memref<48x128xf32, #tpu.memory_space<vmem>>, vector<4x128xf32>
    %185 = vector.extract_strided_slice %184 {offsets = [0, 0], sizes = [1, 128], strides = [1, 1]} : vector<4x128xf32> to vector<1x128xf32>
    %186 = vector.extract_strided_slice %184 {offsets = [1, 0], sizes = [1, 128], strides = [1, 1]} : vector<4x128xf32> to vector<1x128xf32>
    %187 = vector.extract_strided_slice %184 {offsets = [2, 0], sizes = [1, 128], strides = [1, 1]} : vector<4x128xf32> to vector<1x128xf32>
    %188 = vector.extract_strided_slice %184 {offsets = [3, 0], sizes = [1, 128], strides = [1, 1]} : vector<4x128xf32> to vector<1x128xf32>
    %c32_i32_45 = arith.constant 32 : i32
    %189 = tpu.dynamic_rotate %183 by %c32_i32_45 dim 1 : vector<8x128xf32>, i32 -> vector<8x128xf32>
    %c96_i32_46 = arith.constant 96 : i32
    %190 = tpu.dynamic_rotate %183 by %c96_i32_46 dim 1 : vector<8x128xf32>, i32 -> vector<8x128xf32>
    %191 = vector.shape_cast %9 : vector<1x128xi1> to vector<1x128xi1>
    %192 = vector.broadcast %191 : vector<1x128xi1> to vector<8x128xi1>
    %193 = arith.select %192, %189, %190 : vector<8x128xi1>, vector<8x128xf32>
    %c64_i32_47 = arith.constant 64 : i32
    %194 = tpu.dynamic_rotate %183 by %c64_i32_47 dim 1 : vector<8x128xf32>, i32 -> vector<8x128xf32>
    %c64_i32_48 = arith.constant 64 : i32
    %195 = tpu.dynamic_rotate %193 by %c64_i32_48 dim 1 : vector<8x128xf32>, i32 -> vector<8x128xf32>
    %196 = vector.broadcast %185 : vector<1x128xf32> to vector<8x128xf32>
    %197 = arith.mulf %196, %183 : vector<8x128xf32>
    %198 = vector.broadcast %186 : vector<1x128xf32> to vector<8x128xf32>
    %199 = arith.mulf %198, %193 : vector<8x128xf32>
    %200 = arith.addf %197, %199 : vector<8x128xf32>
    %201 = vector.broadcast %187 : vector<1x128xf32> to vector<8x128xf32>
    %202 = arith.mulf %201, %194 : vector<8x128xf32>
    %203 = arith.addf %200, %202 : vector<8x128xf32>
    %204 = vector.broadcast %188 : vector<1x128xf32> to vector<8x128xf32>
    %205 = arith.mulf %204, %195 : vector<8x128xf32>
    %206 = arith.addf %203, %205 : vector<8x128xf32>
    %c4_49 = arith.constant 4 : index
    %c0_50 = arith.constant 0 : index
    %207 = vector.load %arg2[%c4_49, %c0_50] : memref<48x128xf32, #tpu.memory_space<vmem>>, vector<4x128xf32>
    %208 = vector.extract_strided_slice %207 {offsets = [0, 0], sizes = [1, 128], strides = [1, 1]} : vector<4x128xf32> to vector<1x128xf32>
    %209 = vector.extract_strided_slice %207 {offsets = [1, 0], sizes = [1, 128], strides = [1, 1]} : vector<4x128xf32> to vector<1x128xf32>
    %210 = vector.extract_strided_slice %207 {offsets = [2, 0], sizes = [1, 128], strides = [1, 1]} : vector<4x128xf32> to vector<1x128xf32>
    %211 = vector.extract_strided_slice %207 {offsets = [3, 0], sizes = [1, 128], strides = [1, 1]} : vector<4x128xf32> to vector<1x128xf32>
    %c16_i32_51 = arith.constant 16 : i32
    %212 = tpu.dynamic_rotate %206 by %c16_i32_51 dim 1 : vector<8x128xf32>, i32 -> vector<8x128xf32>
    %c112_i32_52 = arith.constant 112 : i32
    %213 = tpu.dynamic_rotate %206 by %c112_i32_52 dim 1 : vector<8x128xf32>, i32 -> vector<8x128xf32>
    %214 = vector.shape_cast %13 : vector<1x128xi1> to vector<1x128xi1>
    %215 = vector.broadcast %214 : vector<1x128xi1> to vector<8x128xi1>
    %216 = arith.select %215, %212, %213 : vector<8x128xi1>, vector<8x128xf32>
    %c64_i32_53 = arith.constant 64 : i32
    %217 = tpu.dynamic_rotate %206 by %c64_i32_53 dim 1 : vector<8x128xf32>, i32 -> vector<8x128xf32>
    %c64_i32_54 = arith.constant 64 : i32
    %218 = tpu.dynamic_rotate %216 by %c64_i32_54 dim 1 : vector<8x128xf32>, i32 -> vector<8x128xf32>
    %219 = vector.broadcast %208 : vector<1x128xf32> to vector<8x128xf32>
    %220 = arith.mulf %219, %206 : vector<8x128xf32>
    %221 = vector.broadcast %209 : vector<1x128xf32> to vector<8x128xf32>
    %222 = arith.mulf %221, %216 : vector<8x128xf32>
    %223 = arith.addf %220, %222 : vector<8x128xf32>
    %224 = vector.broadcast %210 : vector<1x128xf32> to vector<8x128xf32>
    %225 = arith.mulf %224, %217 : vector<8x128xf32>
    %226 = arith.addf %223, %225 : vector<8x128xf32>
    %227 = vector.broadcast %211 : vector<1x128xf32> to vector<8x128xf32>
    %228 = arith.mulf %227, %218 : vector<8x128xf32>
    %229 = arith.addf %226, %228 : vector<8x128xf32>
    %c8 = arith.constant 8 : index
    %c0_55 = arith.constant 0 : index
    %230 = vector.load %arg2[%c8, %c0_55] : memref<48x128xf32, #tpu.memory_space<vmem>>, vector<4x128xf32>
    %231 = vector.extract_strided_slice %230 {offsets = [0, 0], sizes = [1, 128], strides = [1, 1]} : vector<4x128xf32> to vector<1x128xf32>
    %232 = vector.extract_strided_slice %230 {offsets = [1, 0], sizes = [1, 128], strides = [1, 1]} : vector<4x128xf32> to vector<1x128xf32>
    %233 = vector.extract_strided_slice %230 {offsets = [2, 0], sizes = [1, 128], strides = [1, 1]} : vector<4x128xf32> to vector<1x128xf32>
    %234 = vector.extract_strided_slice %230 {offsets = [3, 0], sizes = [1, 128], strides = [1, 1]} : vector<4x128xf32> to vector<1x128xf32>
    %c8_i32_56 = arith.constant 8 : i32
    %235 = tpu.dynamic_rotate %229 by %c8_i32_56 dim 1 : vector<8x128xf32>, i32 -> vector<8x128xf32>
    %c120_i32_57 = arith.constant 120 : i32
    %236 = tpu.dynamic_rotate %229 by %c120_i32_57 dim 1 : vector<8x128xf32>, i32 -> vector<8x128xf32>
    %237 = vector.shape_cast %17 : vector<1x128xi1> to vector<1x128xi1>
    %238 = vector.broadcast %237 : vector<1x128xi1> to vector<8x128xi1>
    %239 = arith.select %238, %235, %236 : vector<8x128xi1>, vector<8x128xf32>
    %c64_i32_58 = arith.constant 64 : i32
    %240 = tpu.dynamic_rotate %229 by %c64_i32_58 dim 1 : vector<8x128xf32>, i32 -> vector<8x128xf32>
    %c64_i32_59 = arith.constant 64 : i32
    %241 = tpu.dynamic_rotate %239 by %c64_i32_59 dim 1 : vector<8x128xf32>, i32 -> vector<8x128xf32>
    %242 = vector.broadcast %231 : vector<1x128xf32> to vector<8x128xf32>
    %243 = arith.mulf %242, %229 : vector<8x128xf32>
    %244 = vector.broadcast %232 : vector<1x128xf32> to vector<8x128xf32>
    %245 = arith.mulf %244, %239 : vector<8x128xf32>
    %246 = arith.addf %243, %245 : vector<8x128xf32>
    %247 = vector.broadcast %233 : vector<1x128xf32> to vector<8x128xf32>
    %248 = arith.mulf %247, %240 : vector<8x128xf32>
    %249 = arith.addf %246, %248 : vector<8x128xf32>
    %250 = vector.broadcast %234 : vector<1x128xf32> to vector<8x128xf32>
    %251 = arith.mulf %250, %241 : vector<8x128xf32>
    %252 = arith.addf %249, %251 : vector<8x128xf32>
    %c12 = arith.constant 12 : index
    %c0_60 = arith.constant 0 : index
    %253 = vector.load %arg2[%c12, %c0_60] : memref<48x128xf32, #tpu.memory_space<vmem>>, vector<4x128xf32>
    %254 = vector.extract_strided_slice %253 {offsets = [0, 0], sizes = [1, 128], strides = [1, 1]} : vector<4x128xf32> to vector<1x128xf32>
    %255 = vector.extract_strided_slice %253 {offsets = [1, 0], sizes = [1, 128], strides = [1, 1]} : vector<4x128xf32> to vector<1x128xf32>
    %256 = vector.extract_strided_slice %253 {offsets = [2, 0], sizes = [1, 128], strides = [1, 1]} : vector<4x128xf32> to vector<1x128xf32>
    %257 = vector.extract_strided_slice %253 {offsets = [3, 0], sizes = [1, 128], strides = [1, 1]} : vector<4x128xf32> to vector<1x128xf32>
    %c4_i32_61 = arith.constant 4 : i32
    %258 = tpu.dynamic_rotate %252 by %c4_i32_61 dim 1 : vector<8x128xf32>, i32 -> vector<8x128xf32>
    %c124_i32_62 = arith.constant 124 : i32
    %259 = tpu.dynamic_rotate %252 by %c124_i32_62 dim 1 : vector<8x128xf32>, i32 -> vector<8x128xf32>
    %260 = vector.shape_cast %21 : vector<1x128xi1> to vector<1x128xi1>
    %261 = vector.broadcast %260 : vector<1x128xi1> to vector<8x128xi1>
    %262 = arith.select %261, %258, %259 : vector<8x128xi1>, vector<8x128xf32>
    %c64_i32_63 = arith.constant 64 : i32
    %263 = tpu.dynamic_rotate %252 by %c64_i32_63 dim 1 : vector<8x128xf32>, i32 -> vector<8x128xf32>
    %c64_i32_64 = arith.constant 64 : i32
    %264 = tpu.dynamic_rotate %262 by %c64_i32_64 dim 1 : vector<8x128xf32>, i32 -> vector<8x128xf32>
    %265 = vector.broadcast %254 : vector<1x128xf32> to vector<8x128xf32>
    %266 = arith.mulf %265, %252 : vector<8x128xf32>
    %267 = vector.broadcast %255 : vector<1x128xf32> to vector<8x128xf32>
    %268 = arith.mulf %267, %262 : vector<8x128xf32>
    %269 = arith.addf %266, %268 : vector<8x128xf32>
    %270 = vector.broadcast %256 : vector<1x128xf32> to vector<8x128xf32>
    %271 = arith.mulf %270, %263 : vector<8x128xf32>
    %272 = arith.addf %269, %271 : vector<8x128xf32>
    %273 = vector.broadcast %257 : vector<1x128xf32> to vector<8x128xf32>
    %274 = arith.mulf %273, %264 : vector<8x128xf32>
    %275 = arith.addf %272, %274 : vector<8x128xf32>
    %c16 = arith.constant 16 : index
    %c0_65 = arith.constant 0 : index
    %276 = vector.load %arg2[%c16, %c0_65] : memref<48x128xf32, #tpu.memory_space<vmem>>, vector<4x128xf32>
    %277 = vector.extract_strided_slice %276 {offsets = [0, 0], sizes = [1, 128], strides = [1, 1]} : vector<4x128xf32> to vector<1x128xf32>
    %278 = vector.extract_strided_slice %276 {offsets = [1, 0], sizes = [1, 128], strides = [1, 1]} : vector<4x128xf32> to vector<1x128xf32>
    %279 = vector.extract_strided_slice %276 {offsets = [2, 0], sizes = [1, 128], strides = [1, 1]} : vector<4x128xf32> to vector<1x128xf32>
    %280 = vector.extract_strided_slice %276 {offsets = [3, 0], sizes = [1, 128], strides = [1, 1]} : vector<4x128xf32> to vector<1x128xf32>
    %c2_i32_66 = arith.constant 2 : i32
    %281 = tpu.dynamic_rotate %275 by %c2_i32_66 dim 1 : vector<8x128xf32>, i32 -> vector<8x128xf32>
    %c126_i32_67 = arith.constant 126 : i32
    %282 = tpu.dynamic_rotate %275 by %c126_i32_67 dim 1 : vector<8x128xf32>, i32 -> vector<8x128xf32>
    %283 = vector.shape_cast %25 : vector<1x128xi1> to vector<1x128xi1>
    %284 = vector.broadcast %283 : vector<1x128xi1> to vector<8x128xi1>
    %285 = arith.select %284, %281, %282 : vector<8x128xi1>, vector<8x128xf32>
    %c64_i32_68 = arith.constant 64 : i32
    %286 = tpu.dynamic_rotate %275 by %c64_i32_68 dim 1 : vector<8x128xf32>, i32 -> vector<8x128xf32>
    %c64_i32_69 = arith.constant 64 : i32
    %287 = tpu.dynamic_rotate %285 by %c64_i32_69 dim 1 : vector<8x128xf32>, i32 -> vector<8x128xf32>
    %288 = vector.broadcast %277 : vector<1x128xf32> to vector<8x128xf32>
    %289 = arith.mulf %288, %275 : vector<8x128xf32>
    %290 = vector.broadcast %278 : vector<1x128xf32> to vector<8x128xf32>
    %291 = arith.mulf %290, %285 : vector<8x128xf32>
    %292 = arith.addf %289, %291 : vector<8x128xf32>
    %293 = vector.broadcast %279 : vector<1x128xf32> to vector<8x128xf32>
    %294 = arith.mulf %293, %286 : vector<8x128xf32>
    %295 = arith.addf %292, %294 : vector<8x128xf32>
    %296 = vector.broadcast %280 : vector<1x128xf32> to vector<8x128xf32>
    %297 = arith.mulf %296, %287 : vector<8x128xf32>
    %298 = arith.addf %295, %297 : vector<8x128xf32>
    %c20 = arith.constant 20 : index
    %c0_70 = arith.constant 0 : index
    %299 = vector.load %arg2[%c20, %c0_70] : memref<48x128xf32, #tpu.memory_space<vmem>>, vector<4x128xf32>
    %300 = vector.extract_strided_slice %299 {offsets = [0, 0], sizes = [1, 128], strides = [1, 1]} : vector<4x128xf32> to vector<1x128xf32>
    %301 = vector.extract_strided_slice %299 {offsets = [1, 0], sizes = [1, 128], strides = [1, 1]} : vector<4x128xf32> to vector<1x128xf32>
    %302 = vector.extract_strided_slice %299 {offsets = [2, 0], sizes = [1, 128], strides = [1, 1]} : vector<4x128xf32> to vector<1x128xf32>
    %303 = vector.extract_strided_slice %299 {offsets = [3, 0], sizes = [1, 128], strides = [1, 1]} : vector<4x128xf32> to vector<1x128xf32>
    %c1_i32_71 = arith.constant 1 : i32
    %304 = tpu.dynamic_rotate %298 by %c1_i32_71 dim 1 : vector<8x128xf32>, i32 -> vector<8x128xf32>
    %c127_i32_72 = arith.constant 127 : i32
    %305 = tpu.dynamic_rotate %298 by %c127_i32_72 dim 1 : vector<8x128xf32>, i32 -> vector<8x128xf32>
    %306 = vector.shape_cast %29 : vector<1x128xi1> to vector<1x128xi1>
    %307 = vector.broadcast %306 : vector<1x128xi1> to vector<8x128xi1>
    %308 = arith.select %307, %304, %305 : vector<8x128xi1>, vector<8x128xf32>
    %c64_i32_73 = arith.constant 64 : i32
    %309 = tpu.dynamic_rotate %298 by %c64_i32_73 dim 1 : vector<8x128xf32>, i32 -> vector<8x128xf32>
    %c64_i32_74 = arith.constant 64 : i32
    %310 = tpu.dynamic_rotate %308 by %c64_i32_74 dim 1 : vector<8x128xf32>, i32 -> vector<8x128xf32>
    %311 = vector.broadcast %300 : vector<1x128xf32> to vector<8x128xf32>
    %312 = arith.mulf %311, %298 : vector<8x128xf32>
    %313 = vector.broadcast %301 : vector<1x128xf32> to vector<8x128xf32>
    %314 = arith.mulf %313, %308 : vector<8x128xf32>
    %315 = arith.addf %312, %314 : vector<8x128xf32>
    %316 = vector.broadcast %302 : vector<1x128xf32> to vector<8x128xf32>
    %317 = arith.mulf %316, %309 : vector<8x128xf32>
    %318 = arith.addf %315, %317 : vector<8x128xf32>
    %319 = vector.broadcast %303 : vector<1x128xf32> to vector<8x128xf32>
    %320 = arith.mulf %319, %310 : vector<8x128xf32>
    %321 = arith.addf %318, %320 : vector<8x128xf32>
    %c16_i32_75 = arith.constant 16 : i32
    %322 = tpu.dynamic_rotate %321 by %c16_i32_75 dim 1 : vector<8x128xf32>, i32 -> vector<8x128xf32>
    %c112_i32_76 = arith.constant 112 : i32
    %323 = tpu.dynamic_rotate %321 by %c112_i32_76 dim 1 : vector<8x128xf32>, i32 -> vector<8x128xf32>
    %324 = vector.shape_cast %13 : vector<1x128xi1> to vector<1x128xi1>
    %325 = vector.broadcast %324 : vector<1x128xi1> to vector<8x128xi1>
    %326 = arith.select %325, %322, %323 : vector<8x128xi1>, vector<8x128xf32>
    %327 = vector.shape_cast %9 : vector<1x128xi1> to vector<1x128xi1>
    %328 = vector.broadcast %327 : vector<1x128xi1> to vector<8x128xi1>
    %329 = arith.select %328, %326, %321 : vector<8x128xi1>, vector<8x128xf32>
    %c8_i32_77 = arith.constant 8 : i32
    %330 = tpu.dynamic_rotate %329 by %c8_i32_77 dim 1 : vector<8x128xf32>, i32 -> vector<8x128xf32>
    %c120_i32_78 = arith.constant 120 : i32
    %331 = tpu.dynamic_rotate %329 by %c120_i32_78 dim 1 : vector<8x128xf32>, i32 -> vector<8x128xf32>
    %332 = vector.shape_cast %17 : vector<1x128xi1> to vector<1x128xi1>
    %333 = vector.broadcast %332 : vector<1x128xi1> to vector<8x128xi1>
    %334 = arith.select %333, %330, %331 : vector<8x128xi1>, vector<8x128xf32>
    %335 = vector.shape_cast %13 : vector<1x128xi1> to vector<1x128xi1>
    %336 = vector.broadcast %335 : vector<1x128xi1> to vector<8x128xi1>
    %337 = arith.select %336, %334, %329 : vector<8x128xi1>, vector<8x128xf32>
    %c4_i32_79 = arith.constant 4 : i32
    %338 = tpu.dynamic_rotate %337 by %c4_i32_79 dim 1 : vector<8x128xf32>, i32 -> vector<8x128xf32>
    %c124_i32_80 = arith.constant 124 : i32
    %339 = tpu.dynamic_rotate %337 by %c124_i32_80 dim 1 : vector<8x128xf32>, i32 -> vector<8x128xf32>
    %340 = vector.shape_cast %21 : vector<1x128xi1> to vector<1x128xi1>
    %341 = vector.broadcast %340 : vector<1x128xi1> to vector<8x128xi1>
    %342 = arith.select %341, %338, %339 : vector<8x128xi1>, vector<8x128xf32>
    %343 = vector.shape_cast %17 : vector<1x128xi1> to vector<1x128xi1>
    %344 = vector.broadcast %343 : vector<1x128xi1> to vector<8x128xi1>
    %345 = arith.select %344, %342, %337 : vector<8x128xi1>, vector<8x128xf32>
    %c2_i32_81 = arith.constant 2 : i32
    %346 = tpu.dynamic_rotate %345 by %c2_i32_81 dim 1 : vector<8x128xf32>, i32 -> vector<8x128xf32>
    %c126_i32_82 = arith.constant 126 : i32
    %347 = tpu.dynamic_rotate %345 by %c126_i32_82 dim 1 : vector<8x128xf32>, i32 -> vector<8x128xf32>
    %348 = vector.shape_cast %25 : vector<1x128xi1> to vector<1x128xi1>
    %349 = vector.broadcast %348 : vector<1x128xi1> to vector<8x128xi1>
    %350 = arith.select %349, %346, %347 : vector<8x128xi1>, vector<8x128xf32>
    %351 = vector.shape_cast %21 : vector<1x128xi1> to vector<1x128xi1>
    %352 = vector.broadcast %351 : vector<1x128xi1> to vector<8x128xi1>
    %353 = arith.select %352, %350, %345 : vector<8x128xi1>, vector<8x128xf32>
    %c1_i32_83 = arith.constant 1 : i32
    %354 = tpu.dynamic_rotate %353 by %c1_i32_83 dim 1 : vector<8x128xf32>, i32 -> vector<8x128xf32>
    %c127_i32_84 = arith.constant 127 : i32
    %355 = tpu.dynamic_rotate %353 by %c127_i32_84 dim 1 : vector<8x128xf32>, i32 -> vector<8x128xf32>
    %356 = vector.shape_cast %29 : vector<1x128xi1> to vector<1x128xi1>
    %357 = vector.broadcast %356 : vector<1x128xi1> to vector<8x128xi1>
    %358 = arith.select %357, %354, %355 : vector<8x128xi1>, vector<8x128xf32>
    %359 = vector.shape_cast %25 : vector<1x128xi1> to vector<1x128xi1>
    %360 = vector.broadcast %359 : vector<1x128xi1> to vector<8x128xi1>
    %361 = arith.select %360, %358, %353 : vector<8x128xi1>, vector<8x128xf32>
    %c24 = arith.constant 24 : index
    %c0_85 = arith.constant 0 : index
    %362 = vector.load %arg2[%c24, %c0_85] : memref<48x128xf32, #tpu.memory_space<vmem>>, vector<4x128xf32>
    %363 = vector.extract_strided_slice %362 {offsets = [0, 0], sizes = [1, 128], strides = [1, 1]} : vector<4x128xf32> to vector<1x128xf32>
    %364 = vector.extract_strided_slice %362 {offsets = [1, 0], sizes = [1, 128], strides = [1, 1]} : vector<4x128xf32> to vector<1x128xf32>
    %365 = vector.extract_strided_slice %362 {offsets = [2, 0], sizes = [1, 128], strides = [1, 1]} : vector<4x128xf32> to vector<1x128xf32>
    %366 = vector.extract_strided_slice %362 {offsets = [3, 0], sizes = [1, 128], strides = [1, 1]} : vector<4x128xf32> to vector<1x128xf32>
    %c32_i32_86 = arith.constant 32 : i32
    %367 = tpu.dynamic_rotate %361 by %c32_i32_86 dim 1 : vector<8x128xf32>, i32 -> vector<8x128xf32>
    %c96_i32_87 = arith.constant 96 : i32
    %368 = tpu.dynamic_rotate %361 by %c96_i32_87 dim 1 : vector<8x128xf32>, i32 -> vector<8x128xf32>
    %369 = vector.shape_cast %9 : vector<1x128xi1> to vector<1x128xi1>
    %370 = vector.broadcast %369 : vector<1x128xi1> to vector<8x128xi1>
    %371 = arith.select %370, %367, %368 : vector<8x128xi1>, vector<8x128xf32>
    %c64_i32_88 = arith.constant 64 : i32
    %372 = tpu.dynamic_rotate %361 by %c64_i32_88 dim 1 : vector<8x128xf32>, i32 -> vector<8x128xf32>
    %c64_i32_89 = arith.constant 64 : i32
    %373 = tpu.dynamic_rotate %371 by %c64_i32_89 dim 1 : vector<8x128xf32>, i32 -> vector<8x128xf32>
    %374 = vector.broadcast %363 : vector<1x128xf32> to vector<8x128xf32>
    %375 = arith.mulf %374, %361 : vector<8x128xf32>
    %376 = vector.broadcast %364 : vector<1x128xf32> to vector<8x128xf32>
    %377 = arith.mulf %376, %371 : vector<8x128xf32>
    %378 = arith.addf %375, %377 : vector<8x128xf32>
    %379 = vector.broadcast %365 : vector<1x128xf32> to vector<8x128xf32>
    %380 = arith.mulf %379, %372 : vector<8x128xf32>
    %381 = arith.addf %378, %380 : vector<8x128xf32>
    %382 = vector.broadcast %366 : vector<1x128xf32> to vector<8x128xf32>
    %383 = arith.mulf %382, %373 : vector<8x128xf32>
    %384 = arith.addf %381, %383 : vector<8x128xf32>
    %c28 = arith.constant 28 : index
    %c0_90 = arith.constant 0 : index
    %385 = vector.load %arg2[%c28, %c0_90] : memref<48x128xf32, #tpu.memory_space<vmem>>, vector<4x128xf32>
    %386 = vector.extract_strided_slice %385 {offsets = [0, 0], sizes = [1, 128], strides = [1, 1]} : vector<4x128xf32> to vector<1x128xf32>
    %387 = vector.extract_strided_slice %385 {offsets = [1, 0], sizes = [1, 128], strides = [1, 1]} : vector<4x128xf32> to vector<1x128xf32>
    %388 = vector.extract_strided_slice %385 {offsets = [2, 0], sizes = [1, 128], strides = [1, 1]} : vector<4x128xf32> to vector<1x128xf32>
    %389 = vector.extract_strided_slice %385 {offsets = [3, 0], sizes = [1, 128], strides = [1, 1]} : vector<4x128xf32> to vector<1x128xf32>
    %c16_i32_91 = arith.constant 16 : i32
    %390 = tpu.dynamic_rotate %384 by %c16_i32_91 dim 1 : vector<8x128xf32>, i32 -> vector<8x128xf32>
    %c112_i32_92 = arith.constant 112 : i32
    %391 = tpu.dynamic_rotate %384 by %c112_i32_92 dim 1 : vector<8x128xf32>, i32 -> vector<8x128xf32>
    %392 = vector.shape_cast %13 : vector<1x128xi1> to vector<1x128xi1>
    %393 = vector.broadcast %392 : vector<1x128xi1> to vector<8x128xi1>
    %394 = arith.select %393, %390, %391 : vector<8x128xi1>, vector<8x128xf32>
    %c64_i32_93 = arith.constant 64 : i32
    %395 = tpu.dynamic_rotate %384 by %c64_i32_93 dim 1 : vector<8x128xf32>, i32 -> vector<8x128xf32>
    %c64_i32_94 = arith.constant 64 : i32
    %396 = tpu.dynamic_rotate %394 by %c64_i32_94 dim 1 : vector<8x128xf32>, i32 -> vector<8x128xf32>
    %397 = vector.broadcast %386 : vector<1x128xf32> to vector<8x128xf32>
    %398 = arith.mulf %397, %384 : vector<8x128xf32>
    %399 = vector.broadcast %387 : vector<1x128xf32> to vector<8x128xf32>
    %400 = arith.mulf %399, %394 : vector<8x128xf32>
    %401 = arith.addf %398, %400 : vector<8x128xf32>
    %402 = vector.broadcast %388 : vector<1x128xf32> to vector<8x128xf32>
    %403 = arith.mulf %402, %395 : vector<8x128xf32>
    %404 = arith.addf %401, %403 : vector<8x128xf32>
    %405 = vector.broadcast %389 : vector<1x128xf32> to vector<8x128xf32>
    %406 = arith.mulf %405, %396 : vector<8x128xf32>
    %407 = arith.addf %404, %406 : vector<8x128xf32>
    %c32 = arith.constant 32 : index
    %c0_95 = arith.constant 0 : index
    %408 = vector.load %arg2[%c32, %c0_95] : memref<48x128xf32, #tpu.memory_space<vmem>>, vector<4x128xf32>
    %409 = vector.extract_strided_slice %408 {offsets = [0, 0], sizes = [1, 128], strides = [1, 1]} : vector<4x128xf32> to vector<1x128xf32>
    %410 = vector.extract_strided_slice %408 {offsets = [1, 0], sizes = [1, 128], strides = [1, 1]} : vector<4x128xf32> to vector<1x128xf32>
    %411 = vector.extract_strided_slice %408 {offsets = [2, 0], sizes = [1, 128], strides = [1, 1]} : vector<4x128xf32> to vector<1x128xf32>
    %412 = vector.extract_strided_slice %408 {offsets = [3, 0], sizes = [1, 128], strides = [1, 1]} : vector<4x128xf32> to vector<1x128xf32>
    %c8_i32_96 = arith.constant 8 : i32
    %413 = tpu.dynamic_rotate %407 by %c8_i32_96 dim 1 : vector<8x128xf32>, i32 -> vector<8x128xf32>
    %c120_i32_97 = arith.constant 120 : i32
    %414 = tpu.dynamic_rotate %407 by %c120_i32_97 dim 1 : vector<8x128xf32>, i32 -> vector<8x128xf32>
    %415 = vector.shape_cast %17 : vector<1x128xi1> to vector<1x128xi1>
    %416 = vector.broadcast %415 : vector<1x128xi1> to vector<8x128xi1>
    %417 = arith.select %416, %413, %414 : vector<8x128xi1>, vector<8x128xf32>
    %c64_i32_98 = arith.constant 64 : i32
    %418 = tpu.dynamic_rotate %407 by %c64_i32_98 dim 1 : vector<8x128xf32>, i32 -> vector<8x128xf32>
    %c64_i32_99 = arith.constant 64 : i32
    %419 = tpu.dynamic_rotate %417 by %c64_i32_99 dim 1 : vector<8x128xf32>, i32 -> vector<8x128xf32>
    %420 = vector.broadcast %409 : vector<1x128xf32> to vector<8x128xf32>
    %421 = arith.mulf %420, %407 : vector<8x128xf32>
    %422 = vector.broadcast %410 : vector<1x128xf32> to vector<8x128xf32>
    %423 = arith.mulf %422, %417 : vector<8x128xf32>
    %424 = arith.addf %421, %423 : vector<8x128xf32>
    %425 = vector.broadcast %411 : vector<1x128xf32> to vector<8x128xf32>
    %426 = arith.mulf %425, %418 : vector<8x128xf32>
    %427 = arith.addf %424, %426 : vector<8x128xf32>
    %428 = vector.broadcast %412 : vector<1x128xf32> to vector<8x128xf32>
    %429 = arith.mulf %428, %419 : vector<8x128xf32>
    %430 = arith.addf %427, %429 : vector<8x128xf32>
    %c36 = arith.constant 36 : index
    %c0_100 = arith.constant 0 : index
    %431 = vector.load %arg2[%c36, %c0_100] : memref<48x128xf32, #tpu.memory_space<vmem>>, vector<4x128xf32>
    %432 = vector.extract_strided_slice %431 {offsets = [0, 0], sizes = [1, 128], strides = [1, 1]} : vector<4x128xf32> to vector<1x128xf32>
    %433 = vector.extract_strided_slice %431 {offsets = [1, 0], sizes = [1, 128], strides = [1, 1]} : vector<4x128xf32> to vector<1x128xf32>
    %434 = vector.extract_strided_slice %431 {offsets = [2, 0], sizes = [1, 128], strides = [1, 1]} : vector<4x128xf32> to vector<1x128xf32>
    %435 = vector.extract_strided_slice %431 {offsets = [3, 0], sizes = [1, 128], strides = [1, 1]} : vector<4x128xf32> to vector<1x128xf32>
    %c4_i32_101 = arith.constant 4 : i32
    %436 = tpu.dynamic_rotate %430 by %c4_i32_101 dim 1 : vector<8x128xf32>, i32 -> vector<8x128xf32>
    %c124_i32_102 = arith.constant 124 : i32
    %437 = tpu.dynamic_rotate %430 by %c124_i32_102 dim 1 : vector<8x128xf32>, i32 -> vector<8x128xf32>
    %438 = vector.shape_cast %21 : vector<1x128xi1> to vector<1x128xi1>
    %439 = vector.broadcast %438 : vector<1x128xi1> to vector<8x128xi1>
    %440 = arith.select %439, %436, %437 : vector<8x128xi1>, vector<8x128xf32>
    %c64_i32_103 = arith.constant 64 : i32
    %441 = tpu.dynamic_rotate %430 by %c64_i32_103 dim 1 : vector<8x128xf32>, i32 -> vector<8x128xf32>
    %c64_i32_104 = arith.constant 64 : i32
    %442 = tpu.dynamic_rotate %440 by %c64_i32_104 dim 1 : vector<8x128xf32>, i32 -> vector<8x128xf32>
    %443 = vector.broadcast %432 : vector<1x128xf32> to vector<8x128xf32>
    %444 = arith.mulf %443, %430 : vector<8x128xf32>
    %445 = vector.broadcast %433 : vector<1x128xf32> to vector<8x128xf32>
    %446 = arith.mulf %445, %440 : vector<8x128xf32>
    %447 = arith.addf %444, %446 : vector<8x128xf32>
    %448 = vector.broadcast %434 : vector<1x128xf32> to vector<8x128xf32>
    %449 = arith.mulf %448, %441 : vector<8x128xf32>
    %450 = arith.addf %447, %449 : vector<8x128xf32>
    %451 = vector.broadcast %435 : vector<1x128xf32> to vector<8x128xf32>
    %452 = arith.mulf %451, %442 : vector<8x128xf32>
    %453 = arith.addf %450, %452 : vector<8x128xf32>
    %c40 = arith.constant 40 : index
    %c0_105 = arith.constant 0 : index
    %454 = vector.load %arg2[%c40, %c0_105] : memref<48x128xf32, #tpu.memory_space<vmem>>, vector<4x128xf32>
    %455 = vector.extract_strided_slice %454 {offsets = [0, 0], sizes = [1, 128], strides = [1, 1]} : vector<4x128xf32> to vector<1x128xf32>
    %456 = vector.extract_strided_slice %454 {offsets = [1, 0], sizes = [1, 128], strides = [1, 1]} : vector<4x128xf32> to vector<1x128xf32>
    %457 = vector.extract_strided_slice %454 {offsets = [2, 0], sizes = [1, 128], strides = [1, 1]} : vector<4x128xf32> to vector<1x128xf32>
    %458 = vector.extract_strided_slice %454 {offsets = [3, 0], sizes = [1, 128], strides = [1, 1]} : vector<4x128xf32> to vector<1x128xf32>
    %c2_i32_106 = arith.constant 2 : i32
    %459 = tpu.dynamic_rotate %453 by %c2_i32_106 dim 1 : vector<8x128xf32>, i32 -> vector<8x128xf32>
    %c126_i32_107 = arith.constant 126 : i32
    %460 = tpu.dynamic_rotate %453 by %c126_i32_107 dim 1 : vector<8x128xf32>, i32 -> vector<8x128xf32>
    %461 = vector.shape_cast %25 : vector<1x128xi1> to vector<1x128xi1>
    %462 = vector.broadcast %461 : vector<1x128xi1> to vector<8x128xi1>
    %463 = arith.select %462, %459, %460 : vector<8x128xi1>, vector<8x128xf32>
    %c64_i32_108 = arith.constant 64 : i32
    %464 = tpu.dynamic_rotate %453 by %c64_i32_108 dim 1 : vector<8x128xf32>, i32 -> vector<8x128xf32>
    %c64_i32_109 = arith.constant 64 : i32
    %465 = tpu.dynamic_rotate %463 by %c64_i32_109 dim 1 : vector<8x128xf32>, i32 -> vector<8x128xf32>
    %466 = vector.broadcast %455 : vector<1x128xf32> to vector<8x128xf32>
    %467 = arith.mulf %466, %453 : vector<8x128xf32>
    %468 = vector.broadcast %456 : vector<1x128xf32> to vector<8x128xf32>
    %469 = arith.mulf %468, %463 : vector<8x128xf32>
    %470 = arith.addf %467, %469 : vector<8x128xf32>
    %471 = vector.broadcast %457 : vector<1x128xf32> to vector<8x128xf32>
    %472 = arith.mulf %471, %464 : vector<8x128xf32>
    %473 = arith.addf %470, %472 : vector<8x128xf32>
    %474 = vector.broadcast %458 : vector<1x128xf32> to vector<8x128xf32>
    %475 = arith.mulf %474, %465 : vector<8x128xf32>
    %476 = arith.addf %473, %475 : vector<8x128xf32>
    %c44 = arith.constant 44 : index
    %c0_110 = arith.constant 0 : index
    %477 = vector.load %arg2[%c44, %c0_110] : memref<48x128xf32, #tpu.memory_space<vmem>>, vector<4x128xf32>
    %478 = vector.extract_strided_slice %477 {offsets = [0, 0], sizes = [1, 128], strides = [1, 1]} : vector<4x128xf32> to vector<1x128xf32>
    %479 = vector.extract_strided_slice %477 {offsets = [1, 0], sizes = [1, 128], strides = [1, 1]} : vector<4x128xf32> to vector<1x128xf32>
    %480 = vector.extract_strided_slice %477 {offsets = [2, 0], sizes = [1, 128], strides = [1, 1]} : vector<4x128xf32> to vector<1x128xf32>
    %481 = vector.extract_strided_slice %477 {offsets = [3, 0], sizes = [1, 128], strides = [1, 1]} : vector<4x128xf32> to vector<1x128xf32>
    %c1_i32_111 = arith.constant 1 : i32
    %482 = tpu.dynamic_rotate %476 by %c1_i32_111 dim 1 : vector<8x128xf32>, i32 -> vector<8x128xf32>
    %c127_i32_112 = arith.constant 127 : i32
    %483 = tpu.dynamic_rotate %476 by %c127_i32_112 dim 1 : vector<8x128xf32>, i32 -> vector<8x128xf32>
    %484 = vector.shape_cast %29 : vector<1x128xi1> to vector<1x128xi1>
    %485 = vector.broadcast %484 : vector<1x128xi1> to vector<8x128xi1>
    %486 = arith.select %485, %482, %483 : vector<8x128xi1>, vector<8x128xf32>
    %c64_i32_113 = arith.constant 64 : i32
    %487 = tpu.dynamic_rotate %476 by %c64_i32_113 dim 1 : vector<8x128xf32>, i32 -> vector<8x128xf32>
    %c64_i32_114 = arith.constant 64 : i32
    %488 = tpu.dynamic_rotate %486 by %c64_i32_114 dim 1 : vector<8x128xf32>, i32 -> vector<8x128xf32>
    %489 = vector.broadcast %478 : vector<1x128xf32> to vector<8x128xf32>
    %490 = arith.mulf %489, %476 : vector<8x128xf32>
    %491 = vector.broadcast %479 : vector<1x128xf32> to vector<8x128xf32>
    %492 = arith.mulf %491, %486 : vector<8x128xf32>
    %493 = arith.addf %490, %492 : vector<8x128xf32>
    %494 = vector.broadcast %480 : vector<1x128xf32> to vector<8x128xf32>
    %495 = arith.mulf %494, %487 : vector<8x128xf32>
    %496 = arith.addf %493, %495 : vector<8x128xf32>
    %497 = vector.broadcast %481 : vector<1x128xf32> to vector<8x128xf32>
    %498 = arith.mulf %497, %488 : vector<8x128xf32>
    %499 = arith.addf %496, %498 : vector<8x128xf32>
    %c32_i32_115 = arith.constant 32 : i32
    %500 = tpu.dynamic_rotate %499 by %c32_i32_115 dim 1 : vector<8x128xf32>, i32 -> vector<8x128xf32>
    %c96_i32_116 = arith.constant 96 : i32
    %501 = tpu.dynamic_rotate %499 by %c96_i32_116 dim 1 : vector<8x128xf32>, i32 -> vector<8x128xf32>
    %502 = vector.shape_cast %9 : vector<1x128xi1> to vector<1x128xi1>
    %503 = vector.broadcast %502 : vector<1x128xi1> to vector<8x128xi1>
    %504 = arith.select %503, %500, %501 : vector<8x128xi1>, vector<8x128xf32>
    %505 = arith.mulf %499, %504 : vector<8x128xf32>
    %cst_117 = arith.constant dense<0.000000e+00> : vector<8xf32>
    %506 = vector.multi_reduction <add>, %505, %cst_117 [1] : vector<8x128xf32> to vector<8xf32>
    %507 = vector.shape_cast %506 : vector<8xf32> to vector<8x1xf32>
    %c16_i32_118 = arith.constant 16 : i32
    %508 = tpu.dynamic_rotate %499 by %c16_i32_118 dim 1 : vector<8x128xf32>, i32 -> vector<8x128xf32>
    %c112_i32_119 = arith.constant 112 : i32
    %509 = tpu.dynamic_rotate %499 by %c112_i32_119 dim 1 : vector<8x128xf32>, i32 -> vector<8x128xf32>
    %510 = vector.shape_cast %13 : vector<1x128xi1> to vector<1x128xi1>
    %511 = vector.broadcast %510 : vector<1x128xi1> to vector<8x128xi1>
    %512 = arith.select %511, %508, %509 : vector<8x128xi1>, vector<8x128xf32>
    %513 = arith.mulf %499, %512 : vector<8x128xf32>
    %cst_120 = arith.constant dense<0.000000e+00> : vector<8xf32>
    %514 = vector.multi_reduction <add>, %513, %cst_120 [1] : vector<8x128xf32> to vector<8xf32>
    %515 = vector.shape_cast %514 : vector<8xf32> to vector<8x1xf32>
    %c8_i32_121 = arith.constant 8 : i32
    %516 = tpu.dynamic_rotate %499 by %c8_i32_121 dim 1 : vector<8x128xf32>, i32 -> vector<8x128xf32>
    %c120_i32_122 = arith.constant 120 : i32
    %517 = tpu.dynamic_rotate %499 by %c120_i32_122 dim 1 : vector<8x128xf32>, i32 -> vector<8x128xf32>
    %518 = vector.shape_cast %17 : vector<1x128xi1> to vector<1x128xi1>
    %519 = vector.broadcast %518 : vector<1x128xi1> to vector<8x128xi1>
    %520 = arith.select %519, %516, %517 : vector<8x128xi1>, vector<8x128xf32>
    %521 = arith.mulf %499, %520 : vector<8x128xf32>
    %cst_123 = arith.constant dense<0.000000e+00> : vector<8xf32>
    %522 = vector.multi_reduction <add>, %521, %cst_123 [1] : vector<8x128xf32> to vector<8xf32>
    %523 = vector.shape_cast %522 : vector<8xf32> to vector<8x1xf32>
    %c4_i32_124 = arith.constant 4 : i32
    %524 = tpu.dynamic_rotate %499 by %c4_i32_124 dim 1 : vector<8x128xf32>, i32 -> vector<8x128xf32>
    %c124_i32_125 = arith.constant 124 : i32
    %525 = tpu.dynamic_rotate %499 by %c124_i32_125 dim 1 : vector<8x128xf32>, i32 -> vector<8x128xf32>
    %526 = vector.shape_cast %21 : vector<1x128xi1> to vector<1x128xi1>
    %527 = vector.broadcast %526 : vector<1x128xi1> to vector<8x128xi1>
    %528 = arith.select %527, %524, %525 : vector<8x128xi1>, vector<8x128xf32>
    %529 = arith.mulf %499, %528 : vector<8x128xf32>
    %cst_126 = arith.constant dense<0.000000e+00> : vector<8xf32>
    %530 = vector.multi_reduction <add>, %529, %cst_126 [1] : vector<8x128xf32> to vector<8xf32>
    %531 = vector.shape_cast %530 : vector<8xf32> to vector<8x1xf32>
    %c2_i32_127 = arith.constant 2 : i32
    %532 = tpu.dynamic_rotate %499 by %c2_i32_127 dim 1 : vector<8x128xf32>, i32 -> vector<8x128xf32>
    %c126_i32_128 = arith.constant 126 : i32
    %533 = tpu.dynamic_rotate %499 by %c126_i32_128 dim 1 : vector<8x128xf32>, i32 -> vector<8x128xf32>
    %534 = vector.shape_cast %25 : vector<1x128xi1> to vector<1x128xi1>
    %535 = vector.broadcast %534 : vector<1x128xi1> to vector<8x128xi1>
    %536 = arith.select %535, %532, %533 : vector<8x128xi1>, vector<8x128xf32>
    %537 = arith.mulf %499, %536 : vector<8x128xf32>
    %cst_129 = arith.constant dense<0.000000e+00> : vector<8xf32>
    %538 = vector.multi_reduction <add>, %537, %cst_129 [1] : vector<8x128xf32> to vector<8xf32>
    %539 = vector.shape_cast %538 : vector<8xf32> to vector<8x1xf32>
    %c1_i32_130 = arith.constant 1 : i32
    %540 = tpu.dynamic_rotate %499 by %c1_i32_130 dim 1 : vector<8x128xf32>, i32 -> vector<8x128xf32>
    %c127_i32_131 = arith.constant 127 : i32
    %541 = tpu.dynamic_rotate %499 by %c127_i32_131 dim 1 : vector<8x128xf32>, i32 -> vector<8x128xf32>
    %542 = vector.shape_cast %29 : vector<1x128xi1> to vector<1x128xi1>
    %543 = vector.broadcast %542 : vector<1x128xi1> to vector<8x128xi1>
    %544 = arith.select %543, %540, %541 : vector<8x128xi1>, vector<8x128xf32>
    %545 = arith.mulf %499, %544 : vector<8x128xf32>
    %cst_132 = arith.constant dense<0.000000e+00> : vector<8xf32>
    %546 = vector.multi_reduction <add>, %545, %cst_132 [1] : vector<8x128xf32> to vector<8xf32>
    %547 = vector.shape_cast %546 : vector<8xf32> to vector<8x1xf32>
    %548 = tpu.concatenate %507, %515, %523, %531, %539, %547 in 1 : vector<8x1xf32>, vector<8x1xf32>, vector<8x1xf32>, vector<8x1xf32>, vector<8x1xf32>, vector<8x1xf32> -> vector<8x6xf32>
    %c0_133 = arith.constant 0 : index
    %c0_134 = arith.constant 0 : index
    %549 = vector.load %arg3[%c0_133, %c0_134] : memref<8x6xf32, #tpu.memory_space<vmem>>, vector<8x6xf32>
    tpu.vector_store %arg3[%c0_133, %c0_134], %548 {strides = array<i32>} : memref<8x6xf32, #tpu.memory_space<vmem>>, vector<8x6xf32>,
    return
  }
  func.func @transform_0(%arg0: i32) -> (i32, i32) {
    %c0_i32 = arith.constant 0 : i32
    %c0_i32_0 = arith.constant 0 : i32
    return %arg0, %c0_i32 : i32, i32
  }
  func.func @transform_1(%arg0: i32) -> (i32, i32) {
    %c0_i32 = arith.constant 0 : i32
    %c0_i32_0 = arith.constant 0 : i32
    %c0_i32_1 = arith.constant 0 : i32
    return %c0_i32, %c0_i32_0 : i32, i32
  }
  func.func @transform_2(%arg0: i32) -> (i32, i32) {
    %c0_i32 = arith.constant 0 : i32
    %c0_i32_0 = arith.constant 0 : i32
    return %arg0, %c0_i32 : i32, i32
  }
}

</mosaic_0001>

<bundles_post_ra>
// kernel: tpu_custom_call.1
= control target key start
LH: loop header
LB: loop body
LE: loop exit
PB: predicated region body
PF: predicated region fallthrough
CT: control target
= control target key end

     0   :  { %7 = vsyncpa [#allocation3], 0  ;;  %s1473_s0 = inlined_call_operand.hbm [shape: f32[8,6], index: 0, kind: input, shape index: {}]   ;;  %s1474_s1 = inlined_call_operand.hbm [shape: f32[48,128], index: 1, kind: input, shape index: {}]   ;;  %s1475_s2 = inlined_call_operand.hbm [shape: f32[8,6], index: 2, kind: output, shape index: {}]  }
   0x1   :  { %8 = vsyncpa [#allocation6], 0 }
   0x2   :  { %9 = vsyncpa [#allocation4], 0  ;;  %s1055_s9 = smov [#allocation2]   ;;  %s1056_s11 = smov [#allocation5]  }
   0x3   :  { %s16_s10 = sshll.u32 %s1055_s9, 4  ;;  %s25_s12 = sshll.u32 %s1056_s11, 4  ;;  %s17_s10 = int_to_ptr.vmem [resolvable:$true] %s16_s10  ;;  %s1101_s12 = int_to_ptr.vmem [resolvable:$true] %s25_s12 }
   0x4   :  { %s983_s15 = scalar_lea.hbm %s1473_s0, 128 }
   0x5   :  { %p984_p0 = scmp.ne.s32.totalorder %s1473_s0, %s983_s15  ;;  %p987_p1 = scmp.lt.u32.totalorder %s983_s15, %s1473_s0 }
   0x7   :  { %p989_p2 = pnand %p987_p1, %p984_p0 }
   0x9   :  { %992 = shalt.err (!%p989_p2)
}
   0xa   :  { %s993_s20 = scalar_lea.vmem %s17_s10, 128  ;;  %p998_p4 = scmp.lt.s32.totalorder %s17_s10, %s17_s10 }
   0xb   :  { %p994_p3 = scmp.ne.s32.totalorder %s17_s10, %s993_s20  ;;  %p999_p5 = scmp.lt.s32.totalorder %s993_s20, %s993_s20 }
   0xd   :  { %p1000_p6 = por %p999_p5, %p998_p4 }
   0xf   :  { %p1001_p7 = pnand %p1000_p6, %p994_p3 }
  0x11   :  { %1004 = shalt.err (!%p1001_p7)
}
  0x12   :  { %19 = dma.hbm_to_vmem [thread:$0]  %s1473_s0, 128, %s17_s10, [#allocation3]  }
  0x13   :  { %s1005_s25 = scalar_lea.hbm %s1474_s1, 768 }
  0x14   :  { %p1006_p8 = scmp.ne.s32.totalorder %s1474_s1, %s1005_s25  ;;  %p1009_p9 = scmp.lt.u32.totalorder %s1005_s25, %s1474_s1 }
  0x16   :  { %p1011_p10 = pnand %p1009_p9, %p1006_p8 }
  0x18   :  { %1014 = shalt.err (!%p1011_p10)
}
  0x19   :  { %s1015_s30 = scalar_lea.vmem %s1101_s12, 768  ;;  %p1020_p12 = scmp.lt.s32.totalorder %s1101_s12, %s1101_s12 }
  0x1a   :  { %p1016_p11 = scmp.ne.s32.totalorder %s1101_s12, %s1015_s30  ;;  %p1021_p13 = scmp.lt.s32.totalorder %s1015_s30, %s1015_s30 }
  0x1c   :  { %p1022_p0 = por %p1021_p13, %p1020_p12 }
  0x1e   :  { %p1023_p1 = pnand %p1022_p0, %p1016_p11 }
  0x20   :  { %1026 = shalt.err (!%p1023_p1)
}
  0x21   :  { %s1057_s0 = smov 128   ;;  %s1058_s3 = smov 8  }
  0x22   :  { %31 = dma.hbm_to_vmem [thread:$0]  %s1474_s1, 768, %s1101_s12, [#allocation6], %s1057_s0, %s1057_s0, %s1058_s3  }
  0x23   :  { %1049 = dma.done.wait [#allocation3], 128  }
  0x24   :  { %1050 = vsyncadd [#allocation3], 4294967168  ;;  %v38_v0 = vlaneseq }
  0x25   :  { %1051 = dma.done.wait [#allocation6], 768  }
  0x26   :  { %1052 = vsyncadd [#allocation6], 4294966528  ;;  %v1059_v1 = vmov 0   ;;  %v1134_v2 = vand.u32 127, %v38_v0  ;;  %v1060_v3 = vmov 0.0   ;;  %s1061_s6 = smov 32  }
  0x27   :  { %968 = vset.pattern.permute.xlu1 %v1059_v1  ;;  %v56_v5 = vld [vmem:[#allocation2] sm:$0xff]  ;;  %s1062_s1 = smov 96   ;;  %v1063_v18 = vmov 683565275   ;;  %v1064_v20 = vmov 2475754826  }
  0x28   :  { %vm54_vm0 = vcmp.eq.s32.totalorder %v1134_v2, 0  ;;  %v1141_v6 = vmul.f32 0.5, %v56_v5  ;;  %v1065_v22 = vmov 2131351028   ;;  %v1066_v24 = vmov 2102212464  }
  0x29   :  { %v1137_v4 = vsel %vm54_vm0, 1.0, %v1060_v3  ;;  %v1067_v26 = vmov 920167782   ;;  %v1068_v33 = vmov 1326507024   ;;  %s1070_s7 = smov 64  }
  0x2a   :  { %265 = vrot.lane.b32.xlu0 %v1137_v4, %s1061_s6  ;;  %v61_v7 = vand.u32 2139095040, %v1141_v6  ;;  %v58_v9 = vand.u32 2147483647, %v1141_v6  ;;  %vm60_vm8 = vcmp.lt.s32.totalorder %v1141_v6, 0  ;;  %vm150_vm0 = vweird.f32 %v1141_v6  ;;  %s1072_s8 = smov 112   ;;  %s1073_s9 = smov 16  }
  0x2b   :  { %s1075_s10 = smov 120   ;;  %s1077_s11 = smov 124  }
  0x2c   :  { %v62_v8 = vshrl.u32 %v61_v7, 23  ;;  %v65_v12 = vand.u32 8388607, %v58_v9  ;;  %vm59_vm9 = vcmp.le.f32.partialorder %v58_v9, 0.7853982  ;;  %s1078_s12 = smov 4  }
  0x2d   :  { %s1080_s13 = smov 126   ;;  %s1081_s14 = smov 2  }
  0x2e   :  { %267 = vrot.lane.b32.xlu0 %v1137_v4, %s1062_s1  ;;  %v925_v10 = vadd.s32 4294967169, %v62_v8  ;;  %v66_v15 = vor.u32 8388608, %v65_v12  ;;  %s1083_s15 = smov 127   ;;  %s1084_s16 = smov 1  }
  0x2f   :  { %s1085_s17 = smov [#allocation7]  }
  0x30   :  { %v68_v11 = vadd.s32 1, %v925_v10  ;;  %v106_v35 = vshll.u32 %v66_v15, 8  ;;  %s915_s18 = sshll.u32 %s1085_s17, 4  ;;  %s916_s18 = int_to_ptr.vmem [resolvable:$true] %s915_s18 }
  0x31   :  { %s1027_s19 = scalar_lea.vmem %s916_s18, 128  ;;  %p1032_p3 = scmp.lt.s32.totalorder %s916_s18, %s916_s18 }
  0x32   :  { %vm69_vm1 = vcmp.gt.s32.totalorder %v68_v11, 0  ;;  %p1028_p2 = scmp.ne.s32.totalorder %s916_s18, %s1027_s19  ;;  %p1033_p4 = scmp.lt.s32.totalorder %s1027_s19, %s1027_s19 }
  0x33   :  { %v70_v13 = vsel %vm69_vm1, %v68_v11, 0 }
  0x34   :  { %v72_v14 = vand.u32 31, %v70_v13  ;;  %v71_v16 = vshrl.u32 %v70_v13, 5  ;;  %p1034_p5 = por %p1033_p4, %p1032_p3 }
  0x36   :  { %v73_v17 = vsub.s32 32, %v72_v14  ;;  %v75_v19 = vshll.u32 %v1063_v18, %v72_v14  ;;  %v78_v21 = vshll.u32 %v1064_v20, %v72_v14  ;;  %v81_v23 = vshll.u32 %v1065_v22, %v72_v14  ;;  %p1035_p6 = pnand %p1034_p5, %p1028_p2 }
  0x37   :  { %v84_v25 = vshll.u32 %v1066_v24, %v72_v14  ;;  %v87_v27 = vshll.u32 %v1067_v26, %v72_v14  ;;  %vm90_vm2 = vcmp.lt.s32.totalorder %v71_v16, 1  ;;  %vm93_vm3 = vcmp.lt.s32.totalorder %v71_v16, 4 }
  0x38   :  { %v74_v28 = vshrl.u32 %v1063_v18, %v73_v17  ;;  %v76_v29 = vshrl.u32 %v1064_v20, %v73_v17  ;;  %v79_v30 = vshrl.u32 %v1065_v22, %v73_v17  ;;  %v82_v31 = vshrl.u32 %v1066_v24, %v73_v17 }
  0x39   :  { %v85_v32 = vshrl.u32 %v1067_v26, %v73_v17  ;;  %v88_v34 = vshrl.u32 %v1068_v33, %v73_v17  ;;  %vm91_vm4 = vcmp.lt.s32.totalorder %v71_v16, 2  ;;  %vm92_vm5 = vcmp.lt.s32.totalorder %v71_v16, 3 }
  0x3a   :  { %v77_v36 = vor.u32 %v76_v29, %v75_v19  ;;  %v80_v37 = vor.u32 %v79_v30, %v78_v21  ;;  %v83_v38 = vor.u32 %v82_v31, %v81_v23 }
  0x3b   :  { %v86_v39 = vor.u32 %v85_v32, %v84_v25  ;;  %v89_v40 = vor.u32 %v88_v34, %v87_v27 }
  0x3c   :  { %v94_v41 = vsel %vm90_vm2, %v74_v28, %v77_v36  ;;  %v95_v42 = vsel %vm93_vm3, %v83_v38, 2102212464  ;;  %v98_v43 = vsel %vm90_vm2, %v77_v36, %v80_v37  ;;  %v102_v44 = vsel %vm90_vm2, %v80_v37, %v83_v38 }
  0x3d   :  { %v96_v45 = vsel %vm92_vm5, %v80_v37, %v95_v42  ;;  %v99_v46 = vsel %vm93_vm3, %v86_v39, 920167782  ;;  %v103_v47 = vsel %vm93_vm3, %v89_v40, 1326507024  ;;  %vm40_vm2 = vcmp.ge.s32.totalorder %v1134_v2, 64 }
  0x3e   :  { %v100_v48 = vsel %vm92_vm5, %v83_v38, %v99_v46  ;;  %v104_v49 = vsel %vm92_vm5, %v86_v39, %v103_v47  ;;  %v97_v50 = vsel %vm91_vm4, %v94_v41, %v96_v45  ;;  %v1069_v45 = vmov 1  }
  0x3f   :  { %v101_v51 = vsel %vm91_vm4, %v98_v43, %v100_v48  ;;  %v105_v52 = vsel %vm91_vm4, %v102_v44, %v104_v49  ;;  %v113_v57 = vmul.u32 %v106_v35, %v97_v50  ;;  %v42_v43 = vand.u32 32, %v1134_v2  ;;  %970 = vset.pattern.permute.xlu0 %v1069_v45 }
  0x40   :  { %v1149_v53 = vmul.u32.u64.low %v106_v35, %v105_v52  ;;  %v1150_v54 = vmul.u32.u64.high %v106_v35, %v105_v52, %v1149_v53  ;;  %v1152_v55 = vmul.u32.u64.low %v106_v35, %v101_v51  ;;  %v1153_v56 = vmul.u32.u64.high %v106_v35, %v101_v51, %v1152_v55 }
  0x41   :  { %vm1171_vm1 = vcmp.ne.s32.totalorder %v42_v43, 0  ;;  %v1071_v51 = vmov -1.0  }
  0x42   :  { %vm115_vm6 = vc.u32 %v1150_v54, %v1152_v55  ;;  %v116_v58 = vadd.s32 1, %v1153_v56  ;;  %v114_v10 = vadd.s32 %v1152_v55, %v1150_v54  ;;  %v1179_v52 = vsel %vm40_vm2, 1.0, %v1071_v51 }
  0x44   :  { %v117_v59 = vsel %vm115_vm6, %v116_v58, %v1153_v56  ;;  %v1074_v58 = vmov 2  }
  0x45   :  { %v118_v60 = vadd.s32 %v117_v59, %v113_v57  ;;  %v44_v57 = vand.u32 16, %v1134_v2 }
  0x47   :  { %v119_v61 = vadd.s32 536870912, %v118_v60  ;;  %vm1188_vm3 = vcmp.ne.s32.totalorder %v44_v57, 0 }
  0x49   :  { %v120_v62 = vshrl.u32 %v119_v61, 30 }
  0x4b   :  { %v121_v63 = vshll.u32 %v120_v62, 30  ;;  %v144_v22 = vsub.s32 4, %v120_v62 }
  0x4d   :  { %v122_v1 = vsub.s32 %v118_v60, %v121_v63  ;;  %v145_v25 = vsel %vm60_vm8, %v144_v22, %v120_v62 }
  0x4e   :  { %v147_v28 = vsel %vm59_vm9, 0, %v145_v25 }
  0x4f   :  { %v124_v3 = vsub.s32 0, %v122_v1  ;;  %v254_v29 = vadd.s32 3, %v147_v28  ;;  %v151_v31 = vand.u32 3, %v147_v28 }
  0x51   :  { %v926_v5 = vmin.u32 %v124_v3, %v122_v1  ;;  %v255_v30 = vand.u32 3, %v254_v29  ;;  %vm156_vm11 = vcmp.eq.s32.totalorder %v151_v31, 2  ;;  %vm153_vm13 = vcmp.eq.s32.totalorder %v151_v31, 0 }
  0x52   :  { %vm152_vm15 = vcmp.lt.s32.totalorder %v151_v31, 2 }
  0x53   :  { %v126_v7 = vclz %v926_v5  ;;  %vm260_vm10 = vcmp.eq.s32.totalorder %v255_v30, 2  ;;  %vm257_vm12 = vcmp.eq.s32.totalorder %v255_v30, 0  ;;  %vm256_vm14 = vcmp.lt.s32.totalorder %v255_v30, 2 }
  0x55   :  { %v927_v8 = vadd.s32 4294967294, %v126_v7 }
  0x57   :  { %vm928_vm7 = vcmp.lt.s32.totalorder %v927_v8, 0 }
  0x58   :  { %v129_v11 = vsel %vm928_vm7, 0, %v927_v8 }
  0x59   :  { %v130_v12 = vsub.s32 32, %v129_v11  ;;  %v131_v13 = vshll.u32 %v122_v1, %v129_v11  ;;  %v134_v14 = vsub.s32 4294967266, %v129_v11  ;;  %v1076_v11 = vmov 3  }
  0x5b   :  { %v132_v15 = vshrl.u32 %v114_v10, %v130_v12  ;;  %v135_v16 = vadd.s32 127, %v134_v14  ;;  %v46_v10 = vand.u32 8, %v1134_v2 }
  0x5d   :  { %v133_v17 = vor.u32 %v132_v15, %v131_v13  ;;  %v136_v18 = vshll.u32 %v135_v16, 23  ;;  %vm1201_vm4 = vcmp.ne.s32.totalorder %v46_v10, 0 }
  0x5f   :  { %v137_v19 = vor.u32 4788187, %v136_v18  ;;  %v140_v20 = vcvt.s32.f32 %v133_v17 }
  0x61   :  { %v138_v21 = vand.u32 2147483647, %v137_v19 }
  0x63   :  { %v141_v23 = vmul.f32 %v140_v20, %v138_v21 }
  0x65   :  { %v142_v24 = vxor.u32 2147483648, %v141_v23 }
  0x67   :  { %v143_v26 = vsel %vm60_vm8, %v142_v24, %v141_v23  ;;  %v48_v23 = vand.u32 4, %v1134_v2  ;;  %v1079_v24 = vmov 4   ;;  %vm897_vm8 = vcmask 7168  }
  0x68   :  { %v146_v27 = vsel %vm59_vm9, %v1141_v6, %v143_v26  ;;  %vm899_vm9 = vcmask 15360  }
  0x69   :  { %979 = vcosq.f32 %v146_v27  ;;  %vm1214_vm5 = vcmp.ne.s32.totalorder %v48_v23, 0 }
  0x6a   :  { %981 = vsinq.f32 %v146_v27 }
  0x73   :  { %v980_v32 = vpop.eup %979 }
  0x74   :  { %v982_v33 = vpop.eup %981  ;;  %v157_v34 = vxor.u32 2147483648, %v980_v32 }
  0x75   :  { %v154_v35 = vxor.u32 2147483648, %v982_v33 }
  0x76   :  { %v262_v9 = vsel %vm260_vm10, %v157_v34, %v982_v33  ;;  %v158_v36 = vsel %vm156_vm11, %v157_v34, %v982_v33  ;;  %vm901_vm10 = vcmask 23552   ;;  %vm903_vm11 = vcmask 31744  }
  0x77   :  { %v259_v37 = vsel %vm257_vm12, %v980_v32, %v154_v35  ;;  %v155_v38 = vsel %vm153_vm13, %v980_v32, %v154_v35  ;;  %vm905_vm12 = vcmask 39936   ;;  %vm907_vm13 = vcmask 48128  }
  0x78   :  { %v263_v39 = vsel %vm256_vm14, %v259_v37, %v262_v9  ;;  %v159_v40 = vsel %vm152_vm15, %v155_v38, %v158_v36  ;;  %v50_v9 = vand.u32 2, %v1134_v2  ;;  %v1082_v36 = vmov 5  }
  0x79   :  { %v1164_v41 = vsel %vm150_vm0, nan, %v263_v39  ;;  %v1167_v42 = vsel %vm150_vm0, nan, %v159_v40 }
  0x7a   :  { %282 = vperm.xlu1 %968, %v1164_v41   ;;  %vm1227_vm6 = vcmp.ne.s32.totalorder %v50_v9, 0 }
  0x7e   :  { %276 = vperm.xlu1 %968, %v1167_v42  }
  0x82   :  { %969 = vset.pattern.permute.xlu1 %v1069_v45 }
  0x9c   :  { %v266_v44 = vpop.permute.xlu0 %265 }
  0xa0   :  { %v268_v46 = vpop.permute.xlu0 %267 }
  0xa1   :  { %v271_v47 = vsel %vm1171_vm1, %v266_v44, %v268_v46 }
  0xa2   :  { %272 = vrot.lane.b32.xlu0 %v271_v47, %s1070_s7 }
  0xf9   :  { %v283_v48 = vpop.permute.xlu1 %282 }
  0xfd   :  { %v277_v49 = vpop.permute.xlu1 %276 }
  0xfe   :  { %v279_v54 = vmul.f32 %v277_v49, %v1137_v4 }
 0x114   :  { %v273_v50 = vpop.permute.xlu0 %272 }
 0x115   :  { %v285_v53 = vmul.f32 %v283_v48, %v273_v50  ;;  %v52_v50 = vand.u32 1, %v1134_v2 }
 0x117   :  { %v286_v55 = vmul.f32 %v285_v53, %v1179_v52  ;;  %vm1240_vm7 = vcmp.ne.s32.totalorder %v52_v50, 0 }
 0x119   :  { %v287_v56 = vsub.f32 %v279_v54, %v286_v55 }
 0x11b   :  { %290 = vrot.lane.b32.xlu0 %v287_v56, %s1072_s8  ;;  %288 = vrot.lane.b32.xlu1 %v287_v56, %s1073_s9 }
 0x11f   :  { %298 = vperm.xlu0 %970, %v1167_v42   ;;  %303 = vperm.xlu1 %969, %v1164_v41  }
 0x123   :  { %972 = vset.pattern.permute.xlu0 %v1074_v58  ;;  %971 = vset.pattern.permute.xlu1 %v1074_v58 }
 0x18d   :  { %v291_v59 = vpop.permute.xlu0 %290  ;;  %v289_v60 = vpop.permute.xlu1 %288 }
 0x18e   :  { %v294_v61 = vsel %vm1188_vm3, %v289_v60, %v291_v59 }
 0x18f   :  { %295 = vrot.lane.b32.xlu1 %v294_v61, %s1070_s7 }
 0x19e   :  { %v304_v62 = vpop.permute.xlu1 %303  ;;  %v299_v63 = vpop.permute.xlu0 %298 }
 0x19f   :  { %v301_v5 = vmul.f32 %v299_v63, %v287_v56 }
 0x201   :  { %v296_v1 = vpop.permute.xlu1 %295 }
 0x202   :  { %v306_v3 = vmul.f32 %v304_v62, %v296_v1 }
 0x204   :  { %v307_v7 = vmul.f32 %v306_v3, %v1179_v52 }
 0x206   :  { %v308_v8 = vsub.f32 %v301_v5, %v307_v7 }
 0x208   :  { %311 = vrot.lane.b32.xlu0 %v308_v8, %s1075_s10  ;;  %309 = vrot.lane.b32.xlu1 %v308_v8, %s1058_s3 }
 0x20c   :  { %319 = vperm.xlu0 %972, %v1167_v42   ;;  %324 = vperm.xlu1 %971, %v1164_v41  }
 0x210   :  { %974 = vset.pattern.permute.xlu0 %v1076_v11  ;;  %973 = vset.pattern.permute.xlu1 %v1076_v11 }
 0x27a   :  { %v312_v13 = vpop.permute.xlu0 %311  ;;  %v310_v14 = vpop.permute.xlu1 %309 }
 0x27b   :  { %v315_v15 = vsel %vm1201_vm4, %v310_v14, %v312_v13 }
 0x27c   :  { %316 = vrot.lane.b32.xlu1 %v315_v15, %s1070_s7 }
 0x28b   :  { %v325_v16 = vpop.permute.xlu1 %324  ;;  %v320_v17 = vpop.permute.xlu0 %319 }
 0x28c   :  { %v322_v20 = vmul.f32 %v320_v17, %v308_v8 }
 0x2ee   :  { %v317_v18 = vpop.permute.xlu1 %316 }
 0x2ef   :  { %v327_v19 = vmul.f32 %v325_v16, %v317_v18 }
 0x2f1   :  { %v328_v21 = vmul.f32 %v327_v19, %v1179_v52 }
 0x2f3   :  { %v329_v22 = vsub.f32 %v322_v20, %v328_v21  ;;  %v434_v21 = vshrl.u32 %v38_v0, 7 }
 0x2f5   :  { %332 = vrot.lane.b32.xlu0 %v329_v22, %s1077_s11  ;;  %330 = vrot.lane.b32.xlu1 %v329_v22, %s1078_s12  ;;  %v1284_v23 = vsub.s32 1, %v434_v21  ;;  %v1291_v0 = vsub.s32 2, %v434_v21 }
 0x2f9   :  { %340 = vperm.xlu0 %974, %v1167_v42   ;;  %345 = vperm.xlu1 %973, %v1164_v41  }
 0x2fd   :  { %976 = vset.pattern.permute.xlu0 %v1079_v24  ;;  %975 = vset.pattern.permute.xlu1 %v1079_v24  ;;  %v423_v24 = vld [vmem:[#allocation5] sm:$0xf] }
 0x367   :  { %v333_v26 = vpop.permute.xlu0 %332  ;;  %v331_v27 = vpop.permute.xlu1 %330 }
 0x368   :  { %v336_v28 = vsel %vm1214_vm5, %v331_v27, %v333_v26  ;;  %v441_v26 = vrot.slane %v423_v24, %v1284_v23 }
 0x369   :  { %337 = vrot.lane.b32.xlu1 %v336_v28, %s1070_s7 }
 0x378   :  { %v346_v29 = vpop.permute.xlu1 %345  ;;  %v341_v30 = vpop.permute.xlu0 %340 }
 0x379   :  { %v343_v33 = vmul.f32 %v341_v30, %v329_v22  ;;  %v1282_v22 = vsub.s32 0, %v434_v21 }
 0x37b   :  { %v436_v27 = vrot.slane %v423_v24, %v1282_v22 }
 0x3db   :  { %v338_v31 = vpop.permute.xlu1 %337 }
 0x3dc   :  { %v348_v32 = vmul.f32 %v346_v29, %v338_v31 }
 0x3de   :  { %v349_v34 = vmul.f32 %v348_v32, %v1179_v52 }
 0x3e0   :  { %v350_v35 = vsub.f32 %v343_v33, %v349_v34  ;;  %v1293_v34 = vsub.s32 3, %v434_v21 }
 0x3e2   :  { %353 = vrot.lane.b32.xlu0 %v350_v35, %s1080_s13  ;;  %351 = vrot.lane.b32.xlu1 %v350_v35, %s1081_s14 }
 0x3e6   :  { %361 = vperm.xlu0 %976, %v1167_v42   ;;  %366 = vperm.xlu1 %975, %v1164_v41  }
 0x3ea   :  { %978 = vset.pattern.permute.xlu0 %v1082_v36  ;;  %977 = vset.pattern.permute.xlu1 %v1082_v36 }
 0x454   :  { %v354_v38 = vpop.permute.xlu0 %353  ;;  %v352_v39 = vpop.permute.xlu1 %351 }
 0x455   :  { %v357_v40 = vsel %vm1227_vm6, %v352_v39, %v354_v38  ;;  %v453_v38 = vrot.slane %v423_v24, %v1293_v34 }
 0x456   :  { %358 = vrot.lane.b32.xlu1 %v357_v40, %s1070_s7 }
 0x465   :  { %v367_v43 = vpop.permute.xlu1 %366  ;;  %v362_v44 = vpop.permute.xlu0 %361 }
 0x466   :  { %v364_v47 = vmul.f32 %v362_v44, %v350_v35  ;;  %v447_v35 = vrot.slane %v423_v24, %v1291_v0 }
 0x4c8   :  { %v359_v45 = vpop.permute.xlu1 %358 }
 0x4c9   :  { %v369_v46 = vmul.f32 %v367_v43, %v359_v45  ;;  %v456_v45 = vld [vmem:[#allocation5 + $0x4] sm:$0xf] }
 0x4cb   :  { %v370_v48 = vmul.f32 %v369_v46, %v1179_v52  ;;  %v474_v46 = vrot.slane %v456_v45, %v1284_v23 }
 0x4cd   :  { %v371_v49 = vsub.f32 %v364_v47, %v370_v48  ;;  %v469_v47 = vrot.slane %v456_v45, %v1282_v22 }
 0x4cf   :  { %374 = vrot.lane.b32.xlu0 %v371_v49, %s1083_s15  ;;  %372 = vrot.lane.b32.xlu1 %v371_v49, %s1084_s16 }
 0x4d3   :  { %382 = vperm.xlu0 %978, %v1167_v42   ;;  %387 = vperm.xlu1 %977, %v1164_v41  }
 0x541   :  { %v375_v53 = vpop.permute.xlu0 %374  ;;  %v373_v54 = vpop.permute.xlu1 %372 }
 0x542   :  { %v378_v55 = vsel %vm1240_vm7, %v373_v54, %v375_v53 }
 0x543   :  { %379 = vrot.lane.b32.xlu1 %v378_v55, %s1070_s7 }
 0x552   :  { %v388_v56 = vpop.permute.xlu1 %387  ;;  %v383_v57 = vpop.permute.xlu0 %382 }
 0x553   :  { %v385_v42 = vmul.f32 %v383_v57, %v371_v49 }
 0x5b5   :  { %v380_v58 = vpop.permute.xlu1 %379 }
 0x5b6   :  { %v390_v59 = vmul.f32 %v388_v56, %v380_v58  ;;  %v480_v56 = vrot.slane %v456_v45, %v1291_v0 }
 0x5b8   :  { %v391_v41 = vmul.f32 %v390_v59, %v1179_v52  ;;  %v486_v59 = vrot.slane %v456_v45, %v1293_v34 }
 0x5ba   :  { %v392_v60 = vsub.f32 %v385_v42, %v391_v41 }
 0x5bc   :  { %395 = vrot.lane.b32.xlu0 %v392_v60, %s1072_s8  ;;  %393 = vrot.lane.b32.xlu1 %v392_v60, %s1073_s9 }
 0x62e   :  { %v396_v2 = vpop.permute.xlu0 %395  ;;  %v394_v61 = vpop.permute.xlu1 %393 }
 0x62f   :  { %v397_v62 = vsel %vm1188_vm3, %v394_v61, %v396_v2  ;;  %v489_v61 = vld [vmem:[#allocation5 + $0x8] sm:$0xf] }
 0x630   :  { %v398_v63 = vsel %vm1171_vm1, %v397_v62, %v392_v60  ;;  %v507_v62 = vrot.slane %v489_v61, %v1284_v23 }
 0x631   :  { %401 = vrot.lane.b32.xlu0 %v398_v63, %s1075_s10  ;;  %399 = vrot.lane.b32.xlu1 %v398_v63, %s1058_s3 }
 0x6a3   :  { %v402_v1 = vpop.permute.xlu0 %401  ;;  %v400_v3 = vpop.permute.xlu1 %399 }
 0x6a4   :  { %v403_v52 = vsel %vm1201_vm4, %v400_v3, %v402_v1 }
 0x6a5   :  { %v404_v5 = vsel %vm1188_vm3, %v403_v52, %v398_v63  ;;  %v502_v63 = vrot.slane %v489_v61, %v1282_v22 }
 0x6a6   :  { %407 = vrot.lane.b32.xlu0 %v404_v5, %s1077_s11  ;;  %405 = vrot.lane.b32.xlu1 %v404_v5, %s1078_s12 }
 0x718   :  { %v408_v7 = vpop.permute.xlu0 %407  ;;  %v406_v8 = vpop.permute.xlu1 %405 }
 0x719   :  { %v409_v10 = vsel %vm1214_vm5, %v406_v8, %v408_v7 }
 0x71a   :  { %v410_v11 = vsel %vm1201_vm4, %v409_v10, %v404_v5  ;;  %v513_v10 = vrot.slane %v489_v61, %v1291_v0 }
 0x71b   :  { %413 = vrot.lane.b32.xlu0 %v410_v11, %s1080_s13  ;;  %411 = vrot.lane.b32.xlu1 %v410_v11, %s1081_s14 }
 0x78d   :  { %v414_v13 = vpop.permute.xlu0 %413  ;;  %v412_v14 = vpop.permute.xlu1 %411 }
 0x78e   :  { %v415_v15 = vsel %vm1227_vm6, %v412_v14, %v414_v13  ;;  %v519_v14 = vrot.slane %v489_v61, %v1293_v34 }
 0x78f   :  { %v416_v16 = vsel %vm1214_vm5, %v415_v15, %v410_v11 }
 0x790   :  { %419 = vrot.lane.b32.xlu0 %v416_v16, %s1083_s15  ;;  %417 = vrot.lane.b32.xlu1 %v416_v16, %s1084_s16 }
 0x802   :  { %v420_v17 = vpop.permute.xlu0 %419  ;;  %v418_v18 = vpop.permute.xlu1 %417 }
 0x803   :  { %v421_v19 = vsel %vm1240_vm7, %v418_v18, %v420_v17 }
 0x804   :  { %v422_v20 = vsel %vm1227_vm6, %v421_v19, %v416_v16  ;;  %v522_v19 = vld [vmem:[#allocation5 + $0xc] sm:$0xf] }
 0x805   :  { %426 = vrot.lane.b32.xlu0 %v422_v20, %s1062_s1  ;;  %424 = vrot.lane.b32.xlu1 %v422_v20, %s1061_s6  ;;  %v437_v32 = vmul.f32 %v436_v27, %v422_v20  ;;  %v535_v21 = vrot.slane %v522_v19, %v1282_v22 }
 0x809   :  { %429 = vrot.lane.b32.xlu1 %v422_v20, %s1070_s7  ;;  %v540_v20 = vrot.slane %v522_v19, %v1284_v23 }
 0x877   :  { %v427_v28 = vpop.permute.xlu0 %426  ;;  %v425_v29 = vpop.permute.xlu1 %424 }
 0x878   :  { %v428_v30 = vsel %vm1171_vm1, %v425_v29, %v427_v28 }
 0x879   :  { %431 = vrot.lane.b32.xlu0 %v428_v30, %s1070_s7  ;;  %v442_v31 = vmul.f32 %v441_v26, %v428_v30 }
 0x87b   :  { %v443_v33 = vadd.f32 %v442_v31, %v437_v32  ;;  %v430_v9 = vpop.permute.xlu1 %429  ;;  %v546_v31 = vrot.slane %v522_v19, %v1291_v0 }
 0x87c   :  { %v448_v36 = vmul.f32 %v447_v35, %v430_v9  ;;  %v552_v35 = vrot.slane %v522_v19, %v1293_v34 }
 0x87e   :  { %v449_v40 = vadd.f32 %v448_v36, %v443_v33 }
 0x8eb   :  { %v432_v39 = vpop.permute.xlu0 %431 }
 0x8ec   :  { %v454_v43 = vmul.f32 %v453_v38, %v432_v39 }
 0x8ee   :  { %v455_v44 = vadd.f32 %v454_v43, %v449_v40  ;;  %v555_v40 = vld [vmem:[#allocation5 + $0x10] sm:$0xf] }
 0x8ef   :  { %v573_v43 = vrot.slane %v555_v40, %v1284_v23 }
 0x8f0   :  { %459 = vrot.lane.b32.xlu0 %v455_v44, %s1072_s8  ;;  %457 = vrot.lane.b32.xlu1 %v455_v44, %s1073_s9  ;;  %v470_v54 = vmul.f32 %v469_v47, %v455_v44 }
 0x8f4   :  { %462 = vrot.lane.b32.xlu1 %v455_v44, %s1070_s7  ;;  %v568_v44 = vrot.slane %v555_v40, %v1282_v22 }
 0x962   :  { %v460_v48 = vpop.permute.xlu0 %459  ;;  %v458_v49 = vpop.permute.xlu1 %457 }
 0x963   :  { %v461_v50 = vsel %vm1188_vm3, %v458_v49, %v460_v48 }
 0x964   :  { %464 = vrot.lane.b32.xlu0 %v461_v50, %s1070_s7  ;;  %v475_v53 = vmul.f32 %v474_v46, %v461_v50 }
 0x966   :  { %v476_v55 = vadd.f32 %v475_v53, %v470_v54  ;;  %v463_v57 = vpop.permute.xlu1 %462  ;;  %v579_v53 = vrot.slane %v555_v40, %v1291_v0 }
 0x967   :  { %v481_v58 = vmul.f32 %v480_v56, %v463_v57  ;;  %v585_v56 = vrot.slane %v555_v40, %v1293_v34  ;;  %v651_v40 = vld [vmem:[#allocation5 + $0x18] sm:$0xf] }
 0x969   :  { %v482_v41 = vadd.f32 %v481_v58, %v476_v55 }
 0x9d6   :  { %v465_v42 = vpop.permute.xlu0 %464 }
 0x9d7   :  { %v487_v60 = vmul.f32 %v486_v59, %v465_v42 }
 0x9d9   :  { %v488_v2 = vadd.f32 %v487_v60, %v482_v41  ;;  %v588_v41 = vld [vmem:[#allocation5 + $0x14] sm:$0xf] }
 0x9da   :  { %v606_v60 = vrot.slane %v588_v41, %v1284_v23 }
 0x9db   :  { %492 = vrot.lane.b32.xlu0 %v488_v2, %s1075_s10  ;;  %490 = vrot.lane.b32.xlu1 %v488_v2, %s1058_s3  ;;  %v503_v7 = vmul.f32 %v502_v63, %v488_v2 }
 0x9df   :  { %495 = vrot.lane.b32.xlu1 %v488_v2, %s1070_s7  ;;  %v601_v2 = vrot.slane %v588_v41, %v1282_v22 }
 0xa4d   :  { %v493_v1 = vpop.permute.xlu0 %492  ;;  %v491_v3 = vpop.permute.xlu1 %490 }
 0xa4e   :  { %v494_v52 = vsel %vm1201_vm4, %v491_v3, %v493_v1 }
 0xa4f   :  { %497 = vrot.lane.b32.xlu0 %v494_v52, %s1070_s7  ;;  %v508_v5 = vmul.f32 %v507_v62, %v494_v52 }
 0xa51   :  { %v509_v8 = vadd.f32 %v508_v5, %v503_v7  ;;  %v496_v11 = vpop.permute.xlu1 %495  ;;  %v612_v5 = vrot.slane %v588_v41, %v1291_v0 }
 0xa52   :  { %v514_v13 = vmul.f32 %v513_v10, %v496_v11  ;;  %v618_v10 = vrot.slane %v588_v41, %v1293_v34  ;;  %v684_v41 = vld [vmem:[#allocation5 + $0x1c] sm:$0xf] }
 0xa54   :  { %v515_v16 = vadd.f32 %v514_v13, %v509_v8 }
 0xac1   :  { %v498_v15 = vpop.permute.xlu0 %497 }
 0xac2   :  { %v520_v17 = vmul.f32 %v519_v14, %v498_v15 }
 0xac4   :  { %v521_v18 = vadd.f32 %v520_v17, %v515_v16 }
 0xac6   :  { %525 = vrot.lane.b32.xlu0 %v521_v18, %s1077_s11  ;;  %523 = vrot.lane.b32.xlu1 %v521_v18, %s1078_s12  ;;  %v536_v29 = vmul.f32 %v535_v21, %v521_v18 }
 0xaca   :  { %528 = vrot.lane.b32.xlu1 %v521_v18, %s1070_s7 }
 0xb38   :  { %v526_v24 = vpop.permute.xlu0 %525  ;;  %v524_v26 = vpop.permute.xlu1 %523 }
 0xb39   :  { %v527_v27 = vsel %vm1214_vm5, %v524_v26, %v526_v24 }
 0xb3a   :  { %530 = vrot.lane.b32.xlu0 %v527_v27, %s1070_s7  ;;  %v541_v28 = vmul.f32 %v540_v20, %v527_v27 }
 0xb3c   :  { %v542_v30 = vadd.f32 %v541_v28, %v536_v29  ;;  %v529_v32 = vpop.permute.xlu1 %528 }
 0xb3d   :  { %v547_v33 = vmul.f32 %v546_v31, %v529_v32 }
 0xb3f   :  { %v548_v36 = vadd.f32 %v547_v33, %v542_v30 }
 0xbac   :  { %v531_v9 = vpop.permute.xlu0 %530 }
 0xbad   :  { %v553_v38 = vmul.f32 %v552_v35, %v531_v9 }
 0xbaf   :  { %v554_v39 = vadd.f32 %v553_v38, %v548_v36 }
 0xbb1   :  { %558 = vrot.lane.b32.xlu0 %v554_v39, %s1080_s13  ;;  %556 = vrot.lane.b32.xlu1 %v554_v39, %s1081_s14  ;;  %v569_v49 = vmul.f32 %v568_v44, %v554_v39  ;;  %v664_v44 = vrot.slane %v651_v40, %v1282_v22 }
 0xbb5   :  { %561 = vrot.lane.b32.xlu1 %v554_v39, %s1070_s7 }
 0xc23   :  { %v559_v45 = vpop.permute.xlu0 %558  ;;  %v557_v46 = vpop.permute.xlu1 %556 }
 0xc24   :  { %v560_v47 = vsel %vm1227_vm6, %v557_v46, %v559_v45 }
 0xc25   :  { %563 = vrot.lane.b32.xlu0 %v560_v47, %s1070_s7  ;;  %v574_v48 = vmul.f32 %v573_v43, %v560_v47  ;;  %v669_v43 = vrot.slane %v651_v40, %v1284_v23 }
 0xc27   :  { %v575_v50 = vadd.f32 %v574_v48, %v569_v49  ;;  %v562_v54 = vpop.permute.xlu1 %561 }
 0xc28   :  { %v580_v55 = vmul.f32 %v579_v53, %v562_v54  ;;  %v675_v53 = vrot.slane %v651_v40, %v1291_v0 }
 0xc2a   :  { %v581_v58 = vadd.f32 %v580_v55, %v575_v50 }
 0xc97   :  { %v564_v57 = vpop.permute.xlu0 %563 }
 0xc98   :  { %v586_v59 = vmul.f32 %v585_v56, %v564_v57  ;;  %v681_v56 = vrot.slane %v651_v40, %v1293_v34 }
 0xc9a   :  { %v587_v42 = vadd.f32 %v586_v59, %v581_v58 }
 0xc9c   :  { %591 = vrot.lane.b32.xlu0 %v587_v42, %s1083_s15  ;;  %589 = vrot.lane.b32.xlu1 %v587_v42, %s1084_s16  ;;  %v602_v3 = vmul.f32 %v601_v2, %v587_v42  ;;  %v697_v2 = vrot.slane %v684_v41, %v1282_v22 }
 0xca0   :  { %594 = vrot.lane.b32.xlu1 %v587_v42, %s1070_s7 }
 0xd0e   :  { %v592_v61 = vpop.permute.xlu0 %591  ;;  %v590_v62 = vpop.permute.xlu1 %589 }
 0xd0f   :  { %v593_v63 = vsel %vm1240_vm7, %v590_v62, %v592_v61 }
 0xd10   :  { %596 = vrot.lane.b32.xlu0 %v593_v63, %s1070_s7  ;;  %v607_v1 = vmul.f32 %v606_v60, %v593_v63  ;;  %v702_v60 = vrot.slane %v684_v41, %v1284_v23 }
 0xd12   :  { %v608_v52 = vadd.f32 %v607_v1, %v602_v3  ;;  %v595_v7 = vpop.permute.xlu1 %594 }
 0xd13   :  { %v613_v8 = vmul.f32 %v612_v5, %v595_v7  ;;  %v708_v5 = vrot.slane %v684_v41, %v1291_v0 }
 0xd15   :  { %v614_v13 = vadd.f32 %v613_v8, %v608_v52 }
 0xd82   :  { %v597_v11 = vpop.permute.xlu0 %596 }
 0xd83   :  { %v619_v14 = vmul.f32 %v618_v10, %v597_v11  ;;  %v714_v10 = vrot.slane %v684_v41, %v1293_v34 }
 0xd85   :  { %v620_v15 = vadd.f32 %v619_v14, %v614_v13 }
 0xd87   :  { %623 = vrot.lane.b32.xlu0 %v620_v15, %s1072_s8  ;;  %621 = vrot.lane.b32.xlu1 %v620_v15, %s1073_s9 }
 0xdf9   :  { %v624_v16 = vpop.permute.xlu0 %623  ;;  %v622_v17 = vpop.permute.xlu1 %621 }
 0xdfa   :  { %v625_v18 = vsel %vm1188_vm3, %v622_v17, %v624_v16  ;;  %v717_v16 = vld [vmem:[#allocation5 + $0x20] sm:$0xf] }
 0xdfb   :  { %v626_v19 = vsel %vm1171_vm1, %v625_v18, %v620_v15  ;;  %v735_v17 = vrot.slane %v717_v16, %v1284_v23  ;;  %v730_v18 = vrot.slane %v717_v16, %v1282_v22 }
 0xdfc   :  { %629 = vrot.lane.b32.xlu0 %v626_v19, %s1075_s10  ;;  %627 = vrot.lane.b32.xlu1 %v626_v19, %s1058_s3 }
 0xe6e   :  { %v630_v20 = vpop.permute.xlu0 %629  ;;  %v628_v21 = vpop.permute.xlu1 %627 }
 0xe6f   :  { %v631_v24 = vsel %vm1201_vm4, %v628_v21, %v630_v20 }
 0xe70   :  { %v632_v26 = vsel %vm1188_vm3, %v631_v24, %v626_v19 }
 0xe71   :  { %635 = vrot.lane.b32.xlu0 %v632_v26, %s1077_s11  ;;  %633 = vrot.lane.b32.xlu1 %v632_v26, %s1078_s12 }
 0xee3   :  { %v636_v27 = vpop.permute.xlu0 %635  ;;  %v634_v28 = vpop.permute.xlu1 %633 }
 0xee4   :  { %v637_v29 = vsel %vm1214_vm5, %v634_v28, %v636_v27  ;;  %v741_v28 = vrot.slane %v717_v16, %v1291_v0 }
 0xee5   :  { %v638_v30 = vsel %vm1201_vm4, %v637_v29, %v632_v26 }
 0xee6   :  { %641 = vrot.lane.b32.xlu0 %v638_v30, %s1080_s13  ;;  %639 = vrot.lane.b32.xlu1 %v638_v30, %s1081_s14 }
 0xf58   :  { %v642_v31 = vpop.permute.xlu0 %641  ;;  %v640_v32 = vpop.permute.xlu1 %639 }
 0xf59   :  { %v643_v33 = vsel %vm1227_vm6, %v640_v32, %v642_v31  ;;  %v747_v31 = vrot.slane %v717_v16, %v1293_v34 }
 0xf5a   :  { %v644_v35 = vsel %vm1214_vm5, %v643_v33, %v638_v30 }
 0xf5b   :  { %647 = vrot.lane.b32.xlu0 %v644_v35, %s1083_s15  ;;  %645 = vrot.lane.b32.xlu1 %v644_v35, %s1084_s16 }
 0xfcd   :  { %v648_v9 = vpop.permute.xlu0 %647  ;;  %v646_v36 = vpop.permute.xlu1 %645 }
 0xfce   :  { %v649_v38 = vsel %vm1240_vm7, %v646_v36, %v648_v9  ;;  %v750_v36 = vld [vmem:[#allocation5 + $0x24] sm:$0xf] }
 0xfcf   :  { %v650_v39 = vsel %vm1227_vm6, %v649_v38, %v644_v35  ;;  %v768_v38 = vrot.slane %v750_v36, %v1284_v23 }
 0xfd0   :  { %654 = vrot.lane.b32.xlu0 %v650_v39, %s1062_s1  ;;  %652 = vrot.lane.b32.xlu1 %v650_v39, %s1061_s6  ;;  %v665_v49 = vmul.f32 %v664_v44, %v650_v39 }
 0xfd4   :  { %657 = vrot.lane.b32.xlu1 %v650_v39, %s1070_s7  ;;  %v763_v39 = vrot.slane %v750_v36, %v1282_v22 }
0x1042   :  { %v655_v45 = vpop.permute.xlu0 %654  ;;  %v653_v46 = vpop.permute.xlu1 %652 }
0x1043   :  { %v656_v47 = vsel %vm1171_vm1, %v653_v46, %v655_v45 }
0x1044   :  { %659 = vrot.lane.b32.xlu0 %v656_v47, %s1070_s7  ;;  %v670_v48 = vmul.f32 %v669_v43, %v656_v47 }
0x1046   :  { %v671_v50 = vadd.f32 %v670_v48, %v665_v49  ;;  %v658_v54 = vpop.permute.xlu1 %657  ;;  %v774_v48 = vrot.slane %v750_v36, %v1291_v0 }
0x1047   :  { %v676_v55 = vmul.f32 %v675_v53, %v658_v54  ;;  %v780_v53 = vrot.slane %v750_v36, %v1293_v34 }
0x1049   :  { %v677_v58 = vadd.f32 %v676_v55, %v671_v50 }
0x10b6   :  { %v660_v57 = vpop.permute.xlu0 %659 }
0x10b7   :  { %v682_v59 = vmul.f32 %v681_v56, %v660_v57 }
0x10b9   :  { %v683_v42 = vadd.f32 %v682_v59, %v677_v58  ;;  %v783_v58 = vld [vmem:[#allocation5 + $0x28] sm:$0xf] }
0x10ba   :  { %v801_v59 = vrot.slane %v783_v58, %v1284_v23 }
0x10bb   :  { %687 = vrot.lane.b32.xlu0 %v683_v42, %s1072_s8  ;;  %685 = vrot.lane.b32.xlu1 %v683_v42, %s1073_s9  ;;  %v698_v3 = vmul.f32 %v697_v2, %v683_v42 }
0x10bf   :  { %690 = vrot.lane.b32.xlu1 %v683_v42, %s1070_s7  ;;  %v796_v42 = vrot.slane %v783_v58, %v1282_v22 }
0x112d   :  { %v688_v61 = vpop.permute.xlu0 %687  ;;  %v686_v62 = vpop.permute.xlu1 %685 }
0x112e   :  { %v689_v63 = vsel %vm1188_vm3, %v686_v62, %v688_v61 }
0x112f   :  { %692 = vrot.lane.b32.xlu0 %v689_v63, %s1070_s7  ;;  %v703_v1 = vmul.f32 %v702_v60, %v689_v63 }
0x1131   :  { %v704_v52 = vadd.f32 %v703_v1, %v698_v3  ;;  %v691_v7 = vpop.permute.xlu1 %690  ;;  %v807_v1 = vrot.slane %v783_v58, %v1291_v0 }
0x1132   :  { %v709_v8 = vmul.f32 %v708_v5, %v691_v7  ;;  %v813_v5 = vrot.slane %v783_v58, %v1293_v34 }
0x1134   :  { %v710_v13 = vadd.f32 %v709_v8, %v704_v52 }
0x11a1   :  { %v693_v11 = vpop.permute.xlu0 %692 }
0x11a2   :  { %v715_v14 = vmul.f32 %v714_v10, %v693_v11 }
0x11a4   :  { %v716_v15 = vadd.f32 %v715_v14, %v710_v13  ;;  %v816_v13 = vld [vmem:[#allocation5 + $0x2c] sm:$0xf] }
0x11a5   :  { %v834_v14 = vrot.slane %v816_v13, %v1284_v23 }
0x11a6   :  { %720 = vrot.lane.b32.xlu0 %v716_v15, %s1075_s10  ;;  %718 = vrot.lane.b32.xlu1 %v716_v15, %s1058_s3  ;;  %v731_v26 = vmul.f32 %v730_v18, %v716_v15 }
0x11aa   :  { %723 = vrot.lane.b32.xlu1 %v716_v15, %s1070_s7  ;;  %v829_v15 = vrot.slane %v816_v13, %v1282_v22 }
0x1218   :  { %v721_v19 = vpop.permute.xlu0 %720  ;;  %v719_v20 = vpop.permute.xlu1 %718 }
0x1219   :  { %v722_v21 = vsel %vm1201_vm4, %v719_v20, %v721_v19 }
0x121a   :  { %725 = vrot.lane.b32.xlu0 %v722_v21, %s1070_s7  ;;  %v736_v24 = vmul.f32 %v735_v17, %v722_v21 }
0x121c   :  { %v737_v27 = vadd.f32 %v736_v24, %v731_v26  ;;  %v724_v29 = vpop.permute.xlu1 %723  ;;  %v840_v24 = vrot.slane %v816_v13, %v1291_v0 }
0x121d   :  { %v742_v30 = vmul.f32 %v741_v28, %v724_v29  ;;  %v846_v28 = vrot.slane %v816_v13, %v1293_v34 }
0x121f   :  { %v743_v33 = vadd.f32 %v742_v30, %v737_v27 }
0x128c   :  { %v726_v32 = vpop.permute.xlu0 %725 }
0x128d   :  { %v748_v35 = vmul.f32 %v747_v31, %v726_v32 }
0x128f   :  { %v749_v9 = vadd.f32 %v748_v35, %v743_v33 }
0x1291   :  { %753 = vrot.lane.b32.xlu0 %v749_v9, %s1077_s11  ;;  %751 = vrot.lane.b32.xlu1 %v749_v9, %s1078_s12  ;;  %v764_v46 = vmul.f32 %v763_v39, %v749_v9 }
0x1295   :  { %756 = vrot.lane.b32.xlu1 %v749_v9, %s1070_s7 }
0x1303   :  { %v754_v40 = vpop.permute.xlu0 %753  ;;  %v752_v43 = vpop.permute.xlu1 %751 }
0x1304   :  { %v755_v44 = vsel %vm1214_vm5, %v752_v43, %v754_v40 }
0x1305   :  { %758 = vrot.lane.b32.xlu0 %v755_v44, %s1070_s7  ;;  %v769_v45 = vmul.f32 %v768_v38, %v755_v44 }
0x1307   :  { %v770_v47 = vadd.f32 %v769_v45, %v764_v46  ;;  %v757_v49 = vpop.permute.xlu1 %756 }
0x1308   :  { %v775_v50 = vmul.f32 %v774_v48, %v757_v49 }
0x130a   :  { %v776_v55 = vadd.f32 %v775_v50, %v770_v47 }
0x1377   :  { %v759_v54 = vpop.permute.xlu0 %758 }
0x1378   :  { %v781_v56 = vmul.f32 %v780_v53, %v759_v54 }
0x137a   :  { %v782_v57 = vadd.f32 %v781_v56, %v776_v55 }
0x137c   :  { %786 = vrot.lane.b32.xlu0 %v782_v57, %s1080_s13  ;;  %784 = vrot.lane.b32.xlu1 %v782_v57, %s1081_s14  ;;  %v797_v62 = vmul.f32 %v796_v42, %v782_v57 }
0x1380   :  { %789 = vrot.lane.b32.xlu1 %v782_v57, %s1070_s7 }
0x13ee   :  { %v787_v41 = vpop.permute.xlu0 %786  ;;  %v785_v60 = vpop.permute.xlu1 %784 }
0x13ef   :  { %v788_v2 = vsel %vm1227_vm6, %v785_v60, %v787_v41 }
0x13f0   :  { %791 = vrot.lane.b32.xlu0 %v788_v2, %s1070_s7  ;;  %v802_v61 = vmul.f32 %v801_v59, %v788_v2 }
0x13f2   :  { %v803_v63 = vadd.f32 %v802_v61, %v797_v62  ;;  %v790_v3 = vpop.permute.xlu1 %789 }
0x13f3   :  { %v808_v52 = vmul.f32 %v807_v1, %v790_v3 }
0x13f5   :  { %v809_v8 = vadd.f32 %v808_v52, %v803_v63 }
0x1462   :  { %v792_v7 = vpop.permute.xlu0 %791 }
0x1463   :  { %v814_v10 = vmul.f32 %v813_v5, %v792_v7 }
0x1465   :  { %v815_v11 = vadd.f32 %v814_v10, %v809_v8 }
0x1467   :  { %819 = vrot.lane.b32.xlu0 %v815_v11, %s1083_s15  ;;  %817 = vrot.lane.b32.xlu1 %v815_v11, %s1084_s16  ;;  %v830_v20 = vmul.f32 %v829_v15, %v815_v11 }
0x146b   :  { %822 = vrot.lane.b32.xlu1 %v815_v11, %s1070_s7 }
0x14d9   :  { %v820_v16 = vpop.permute.xlu0 %819  ;;  %v818_v17 = vpop.permute.xlu1 %817 }
0x14da   :  { %v821_v18 = vsel %vm1240_vm7, %v818_v17, %v820_v16 }
0x14db   :  { %824 = vrot.lane.b32.xlu0 %v821_v18, %s1070_s7  ;;  %v835_v19 = vmul.f32 %v834_v14, %v821_v18 }
0x14dd   :  { %v836_v21 = vadd.f32 %v835_v19, %v830_v20  ;;  %v823_v26 = vpop.permute.xlu1 %822 }
0x14de   :  { %v841_v27 = vmul.f32 %v840_v24, %v823_v26 }
0x14e0   :  { %v842_v23 = vadd.f32 %v841_v27, %v836_v21 }
0x154d   :  { %v825_v29 = vpop.permute.xlu0 %824 }
0x154e   :  { %v847_v30 = vmul.f32 %v846_v28, %v825_v29 }
0x1550   :  { %v848_v22 = vadd.f32 %v847_v30, %v842_v23 }
0x1552   :  { %851 = vrot.lane.b32.xlu0 %v848_v22, %s1062_s1  ;;  %849 = vrot.lane.b32.xlu1 %v848_v22, %s1061_s6 }
0x1556   :  { %857 = vrot.lane.b32.xlu0 %v848_v22, %s1073_s9  ;;  %891 = vrot.lane.b32.xlu1 %v848_v22, %s1083_s15 }
0x155a   :  { %859 = vrot.lane.b32.xlu0 %v848_v22, %s1072_s8 }
0x155e   :  { %865 = vrot.lane.b32.xlu0 %v848_v22, %s1058_s3 }
0x1562   :  { %867 = vrot.lane.b32.xlu0 %v848_v22, %s1075_s10 }
0x1566   :  { %873 = vrot.lane.b32.xlu0 %v848_v22, %s1078_s12 }
0x156a   :  { %875 = vrot.lane.b32.xlu0 %v848_v22, %s1077_s11 }
0x156e   :  { %881 = vrot.lane.b32.xlu0 %v848_v22, %s1081_s14 }
0x1572   :  { %883 = vrot.lane.b32.xlu0 %v848_v22, %s1080_s13 }
0x1576   :  { %889 = vrot.lane.b32.xlu0 %v848_v22, %s1084_s16 }
0x15c4   :  { %v852_v0 = vpop.permute.xlu0 %851  ;;  %v850_v34 = vpop.permute.xlu1 %849 }
0x15c5   :  { %v853_v31 = vsel %vm1171_vm1, %v850_v34, %v852_v0 }
0x15c6   :  { %v854_v32 = vmul.f32 %v853_v31, %v848_v22 }
0x15c8   :  { %v858_v33 = vpop.permute.xlu0 %857  ;;  %855 = vadd.xlane.f32.xlu1 %v854_v32  ;;  %v892_v50 = vpop.permute.xlu1 %891 }
0x15cc   :  { %v860_v35 = vpop.permute.xlu0 %859 }
0x15cd   :  { %v861_v9 = vsel %vm1188_vm3, %v858_v33, %v860_v35 }
0x15ce   :  { %v862_v36 = vmul.f32 %v861_v9, %v848_v22 }
0x15d0   :  { %863 = vadd.xlane.f32.xlu0 %v862_v36  ;;  %v866_v38 = vpop.permute.xlu0 %865 }
0x15d4   :  { %v868_v39 = vpop.permute.xlu0 %867 }
0x15d5   :  { %v869_v40 = vsel %vm1201_vm4, %v866_v38, %v868_v39 }
0x15d6   :  { %v870_v43 = vmul.f32 %v869_v40, %v848_v22 }
0x15d8   :  { %v874_v44 = vpop.permute.xlu0 %873  ;;  %871 = vadd.xlane.f32.xlu1 %v870_v43 }
0x15dc   :  { %v876_v45 = vpop.permute.xlu0 %875 }
0x15dd   :  { %v877_v6 = vsel %vm1214_vm5, %v874_v44, %v876_v45 }
0x15de   :  { %v878_v46 = vmul.f32 %v877_v6, %v848_v22 }
0x15e0   :  { %879 = vadd.xlane.f32.xlu0 %v878_v46  ;;  %v882_v47 = vpop.permute.xlu0 %881 }
0x15e4   :  { %v884_v48 = vpop.permute.xlu0 %883 }
0x15e5   :  { %v885_v4 = vsel %vm1227_vm6, %v882_v47, %v884_v48 }
0x15e6   :  { %v886_v49 = vmul.f32 %v885_v4, %v848_v22 }
0x15e8   :  { %887 = vadd.xlane.f32.xlu0 %v886_v49  ;;  %v890_v53 = vpop.permute.xlu0 %889 }
0x15e9   :  { %v893_v12 = vsel %vm1240_vm7, %v890_v53, %v892_v50 }
0x15ea   :  { %v894_v54 = vmul.f32 %v893_v12, %v848_v22 }
0x15ec   :  { %895 = vadd.xlane.f32.xlu0 %v894_v54 }
0x1655   :  { %v856_v56 = vpop.xlane.xlu1 %855 }
0x165d   :  { %v864_v55 = vpop.xlane.xlu0 %863 }
0x165e   :  { %v898_v59 = vsel %vm897_vm8, %v856_v56, %v864_v55 }
0x1665   :  { %v872_v57 = vpop.xlane.xlu1 %871 }
0x1666   :  { %v900_v37 = vsel %vm899_vm9, %v898_v59, %v872_v57 }
0x166d   :  { %v880_v25 = vpop.xlane.xlu0 %879 }
0x166e   :  { %v902_v42 = vsel %vm901_vm10, %v900_v37, %v880_v25 }
0x1675   :  { %v888_v58 = vpop.xlane.xlu0 %887 }
0x1676   :  { %v904_v51 = vsel %vm903_vm11, %v902_v42, %v888_v58 }
0x1679   :  { %v896_v41 = vpop.xlane.xlu0 %895 }
0x167a   :  { %v906_v60 = vsel %vm905_vm12, %v904_v51, %v896_v41 }
0x167b   :  { %908 = vst.msk [vmem:[#allocation7] sm:$0xff] %vm907_vm13, %v906_v60 }
0x167c   :  { %1038 = shalt.err (!%p1035_p6)
}
0x167d   :  { %s1039_s22 = scalar_lea.hbm %s1475_s2, 128 }
0x167e   :  { %p1040_p7 = scmp.ne.s32.totalorder %s1475_s2, %s1039_s22  ;;  %p1043_p8 = scmp.lt.u32.totalorder %s1039_s22, %s1475_s2 }
0x1680   :  { %p1045_p9 = pnand %p1043_p8, %p1040_p7 }
0x1682   :  { %1048 = shalt.err (!%p1045_p9)
}
0x1683   :  { %918 = dma.vmem_to_hbm [thread:$0]  %s916_s18, 128, %s1475_s2, [#allocation4]  }
0x1684   :  { %1053 = dma.done.wait [#allocation4], 128  }
0x1685   :  { %1054 = vsyncadd [#allocation4], 4294967168 }
0x1686   :  { %922 = vsyncpa [#allocation3], 1 }
0x1687   :  { %923 = vsyncpa [#allocation6], 1 }
0x1688   :  { %924 = vsyncpa [#allocation4], 1 }

</bundles_post_ra>
